<compile_context>
chip_gen: v6e
topology: v6e:2x2x1
jax: 0.10.0
libtpu: 0.0.40
codegen_flags: <defaults>
</compile_context>

<pallas_src>
import functools

import jax
import jax.numpy as jnp
import numpy as np
from jax.experimental import pallas as pl
from jax.experimental.pallas import tpu as pltpu


def _group_norm_lrelu_folded(y, c, pg, gamma, beta, n_points, eps, slope):
    """GroupNorm (per-cloud stats over all N points) + LeakyReLU, fully folded.

    y     : (Bt, N, C) f32 activations (WITHOUT the broadcast row c added)
    c     : (Bt, C) per-cloud broadcast row folded analytically into stats/shift, or None
    pg    : (C, C) group-averaging matrix, pg[i, j] = 1/(N*cg) if group(i)==group(j) else 0
    gamma : (1, C), beta : (1, C)
    """
    bt = y.shape[0]
    s = jnp.sum(y, axis=1)                       # (Bt, C) column sums over points
    sq = jnp.sum(y * y, axis=1)                  # (Bt, C) column sums of squares
    if c is not None:
        # y_true = y + c (broadcast over points):  sum += N*c,  sumsq += 2*c*sum + N*c^2
        sq = sq + 2.0 * c * s + float(n_points) * (c * c)
        s = s + float(n_points) * c
    mean = jnp.dot(s, pg, preferred_element_type=jnp.float32)      # per-group mean / chan
    mean_sq = jnp.dot(sq, pg, preferred_element_type=jnp.float32)  # per-group E[x^2] / chan
    # NOTE: E[x^2]-E[x]^2 in f32 is cancellation-prone for very large per-group means;
    # activations here are GroupNorm/LeakyReLU-scale so this stays well within tolerance.
    var = jnp.maximum(mean_sq - mean * mean, 0.0)                  # biased var (torch)
    scale = gamma * jax.lax.rsqrt(var + eps)                       # (Bt, C) folded affine
    shift = beta - mean * scale
    if c is not None:
        shift = shift + c * scale                                  # fold broadcast row
    z = y * scale[:, None, :] + shift[:, None, :]                  # one FMA-shaped pass
    return jnp.where(z >= 0.0, z, slope * z)                       # LeakyReLU(0.1)


def _desc_extractor_kernel(x1_ref, attn_ref, w1m_ref, w1x_ref, w1a_ref, w2_ref,
                           g1_ref, b1_ref, g2_ref, b2_ref, pg_ref, o_ref,
                           *, eps, slope):
    """One grid step == Bt whole point clouds."""
    bt, n, cin = x1_ref.shape
    cout = w2_ref.shape[1]

    x1 = x1_ref[...]                              # (Bt, N, Cin)  f32
    attn = attn_ref[...]                          # (Bt, N, Cout) f32
    pg = pg_ref[...]                              # (Cout, Cout)  f32

    # ----- layer 1: Linear(2*Cin+Cout -> Cout, bias=False) without materializing cat ----
    # lane-dense (Bt*N, C) bf16 MXU matmuls with f32 accumulation
    x1b = x1.reshape(bt * n, cin).astype(jnp.bfloat16)
    atb = attn.reshape(bt * n, cout).astype(jnp.bfloat16)
    y1 = (jnp.dot(x1b, w1x_ref[...], preferred_element_type=jnp.float32)
          + jnp.dot(atb, w1a_ref[...], preferred_element_type=jnp.float32)
          ).reshape(bt, n, cout)                  # (Bt, N, Cout) f32

    # per-cloud global-max feature -> one (Bt, Cin)x(Cin, Cout) dot; folded into the norm
    x1_max = jnp.max(x1, axis=1)                  # (Bt, Cin)
    c1 = jnp.dot(x1_max.astype(jnp.bfloat16), w1m_ref[...],
                 preferred_element_type=jnp.float32)               # (Bt, Cout)

    z1 = _group_norm_lrelu_folded(y1, c1, pg, g1_ref[...], b1_ref[...], n, eps, slope)

    # ----- layer 2: Linear(Cout -> Cout, bias=False) + GroupNorm + LeakyReLU -----
    y2 = jnp.dot(z1.reshape(bt * n, cout).astype(jnp.bfloat16), w2_ref[...],
                 preferred_element_type=jnp.float32).reshape(bt, n, cout)
    z2 = _group_norm_lrelu_folded(y2, None, pg, g2_ref[...], b2_ref[...], n, eps, slope)

    # ----- max over points + final ReLU, one lane-dense (Bt, 1, Cout) store -----
    desc = jnp.max(z2, axis=1)                    # (Bt, Cout)
    o_ref[...] = jnp.maximum(desc, 0.0).reshape(bt, 1, cout)


def desc_extractor_forward(params, x1, attentive_feature_map, *,
                           num_groups=32, block_clouds=4):
    """JAX wrapper: split W1 into row blocks, batch Bt clouds per step, launch kernel.

    params['w1'] is expected in (2*Cin+Cout, Cout) 'x @ W' orientation with row blocks
    ordered [max | x1 | attn] (i.e. nn.Linear.weight.T of the first UnaryBlock).
    """
    B, N, Cin = x1.shape
    Cout = params["w2"].shape[1]
    assert Cout % num_groups == 0
    cg = Cout // num_groups

    # weights cast to bf16 once (MXU-native operands); split W1 row blocks
    w1 = params["w1"].astype(jnp.bfloat16)
    w1m, w1x, w1a = w1[:Cin], w1[Cin:2 * Cin], w1[2 * Cin:]
    w2 = params["w2"].astype(jnp.bfloat16)

    # group-averaging matrix: per-channel group mean = stats_row @ pg
    gid = np.arange(Cout) // cg
    pg = jnp.asarray((gid[:, None] == gid[None, :]).astype(np.float32) / float(N * cg))

    g1 = params["gamma1"].reshape(1, Cout).astype(jnp.float32)
    b1 = params["beta1"].reshape(1, Cout).astype(jnp.float32)
    g2 = params["gamma2"].reshape(1, Cout).astype(jnp.float32)
    b2 = params["beta2"].reshape(1, Cout).astype(jnp.float32)

    # ---- pick clouds-per-block from a VMEM budget (safe on v7x's 64 MiB per TC) ----
    per_cloud = (2 * N * (Cin + Cout) * 4        # double-buffered f32 input blocks
                 + 6 * N * Cout * 4)             # f32/bf16 activation temporaries
    param_bytes = 2 * ((2 * Cin + Cout) * Cout * 2 + Cout * Cout * 4 + 8 * Cout * 4)
    budget = 40 * 1024 * 1024
    bt = max(1, min(block_clouds, B, max(1, (budget - param_bytes) // per_cloud)))
    b_pad = ((B + bt - 1) // bt) * bt
    if b_pad != B:                               # pad with zero clouds, sliced off below
        padw = ((0, b_pad - B), (0, 0), (0, 0))
        x1_in = jnp.pad(x1, padw)
        attn_in = jnp.pad(attentive_feature_map, padw)
    else:
        x1_in, attn_in = x1, attentive_feature_map

    vmem_limit = int(min(max(bt * per_cloud + param_bytes + (2 << 20), 16 << 20), 48 << 20))

    kernel = functools.partial(_desc_extractor_kernel, eps=1e-5, slope=0.1)
    rep = lambda b: (0, 0)                       # grid-invariant params stay resident

    out = pl.pallas_call(
        kernel,
        grid=(b_pad // bt,),
        out_shape=jax.ShapeDtypeStruct((b_pad, 1, Cout), jnp.float32),
        in_specs=[
            pl.BlockSpec((bt, N, Cin), lambda b: (b, 0, 0)),     # x1 (Bt clouds)
            pl.BlockSpec((bt, N, Cout), lambda b: (b, 0, 0)),    # attentive feature map
            pl.BlockSpec((Cin, Cout), rep),                      # W1[max rows]   (bf16)
            pl.BlockSpec((Cin, Cout), rep),                      # W1[x1 rows]    (bf16)
            pl.BlockSpec((Cout, Cout), rep),                     # W1[attn rows]  (bf16)
            pl.BlockSpec((Cout, Cout), rep),                     # W2             (bf16)
            pl.BlockSpec((1, Cout), rep),                        # gamma1
            pl.BlockSpec((1, Cout), rep),                        # beta1
            pl.BlockSpec((1, Cout), rep),                        # gamma2
            pl.BlockSpec((1, Cout), rep),                        # beta2
            pl.BlockSpec((Cout, Cout), rep),                     # group-averaging matrix
        ],
        out_specs=pl.BlockSpec((bt, 1, Cout), lambda b: (b, 0, 0)),
        compiler_params=pltpu.CompilerParams(
            dimension_semantics=("parallel",),                   # megacore over cloud blocks
            vmem_limit_bytes=vmem_limit),
    )(x1_in, attn_in, w1m, w1x, w1a, w2, g1, b1, g2, b2, pg)
    return out[:B, 0, :]                                         # (B, Cout)


def init_params(key, in_channels, out_channels):
    """Deterministic synthetic parameters (shapes as DescExtractor.__init__ implies)."""
    fan1 = 2 * in_channels + out_channels
    k1, k2, k3, k4, k5, k6 = jax.random.split(key, 6)
    w1 = (jax.random.normal(k1, (fan1, out_channels)) / np.sqrt(fan1)).astype(jnp.float32)
    w2 = (jax.random.normal(k2, (out_channels, out_channels)) /
          np.sqrt(out_channels)).astype(jnp.float32)
    gamma1 = (1.0 + 0.1 * jax.random.normal(k3, (out_channels,))).astype(jnp.float32)
    beta1 = (0.1 * jax.random.normal(k4, (out_channels,))).astype(jnp.float32)
    gamma2 = (1.0 + 0.1 * jax.random.normal(k5, (out_channels,))).astype(jnp.float32)
    beta2 = (0.1 * jax.random.normal(k6, (out_channels,))).astype(jnp.float32)
    return dict(w1=w1, w2=w2, gamma1=gamma1, beta1=beta1, gamma2=gamma2, beta2=beta2)


def reference_forward_np(params, x1, attn, *, num_groups, eps=1e-5, slope=0.1,
                         bf16_matmul_operands=False):
    """Pure numpy (float64) mirror of the PyTorch DescExtractor.forward.

    With bf16_matmul_operands=True the matmul inputs are rounded through bf16, mirroring
    the kernel's MXU operand dtype (accumulation stays exact), so tolerances stay tight.
    """
    f = lambda a: np.asarray(a, dtype=np.float64)
    if bf16_matmul_operands:
        q = lambda a: np.asarray(
            jnp.asarray(np.asarray(a, np.float32), dtype=jnp.bfloat16).astype(jnp.float32),
            dtype=np.float64)
    else:
        q = f
    x1 = f(x1)
    attn = f(attn)
    w1, w2 = params["w1"], params["w2"]
    g1, b1 = f(params["gamma1"]), f(params["beta1"])
    g2, b2 = f(params["gamma2"]), f(params["beta2"])
    B, N, Cin = x1.shape
    Cout = np.asarray(w2).shape[1]

    x2 = x1.max(axis=1, keepdims=True).repeat(N, axis=1)      # (B, N, Cin)
    x2 = np.concatenate([x2, x1, attn], axis=-1)              # (B, N, 2Cin+Cout)

    def unary(x, w, gamma, beta):
        y = q(x) @ q(w)                                       # bias-free linear
        cg = Cout // num_groups
        yg = y.reshape(B, N, num_groups, cg)
        mu = yg.mean(axis=(1, 3), keepdims=True)              # per (cloud, group)
        var = yg.var(axis=(1, 3), keepdims=True)              # biased, as torch
        yn = ((yg - mu) / np.sqrt(var + eps)).reshape(B, N, Cout)
        yn = yn * gamma + beta
        return np.where(yn >= 0.0, yn, slope * yn)            # LeakyReLU(0.1)

    z1 = unary(x2, w1, g1, b1)
    z2 = unary(z1, w2, g2, b2)
    return np.maximum(z2.max(axis=1), 0.0)                    # (B, Cout), final relu


if __name__ == "__main__":
    # small shapes (GroupNorm default num_groups=32 requires Cout % 32 == 0);
    # B=8 with Bt=4 clouds per grid step exercises the batched-block pipeline.
    B, N = 8, 64                 # point clouds, points per cloud
    Cin, Cout = 64, 128          # in_channels, out_channels (lane-dense last dims)
    num_groups = 32              # UnaryBlock default group_norm=32

    key = jax.random.PRNGKey(0)
    kparam, kx1, katt = jax.random.split(key, 3)

    params = init_params(kparam, Cin, Cout)
    x1 = jax.random.normal(kx1, (B, N, Cin), dtype=jnp.float32)
    attn_map = jax.random.normal(katt, (B, N, Cout), dtype=jnp.float32)

    out = desc_extractor_forward(params, x1, attn_map,
                                 num_groups=num_groups, block_clouds=4)
    out = jax.block_until_ready(out)

    # compare against a bf16-operand-matched float64 reference (kernel accumulates in f32)
    ref = reference_forward_np(params, x1, attn_map, num_groups=num_groups,
                               bf16_matmul_operands=True)
    np.testing.assert_allclose(np.asarray(out), ref, rtol=1e-2, atol=1e-2)

    print("KERNEL_OK")
</pallas_src>

<mosaic_0001>
module attributes {stable_mosaic.version = 11 : i64} {
  func.func @_desc_extractor_kernel(%arg0: i32, %arg1: memref<4x64x64xf32, #tpu.memory_space<vmem>>, %arg2: memref<4x64x128xf32, #tpu.memory_space<vmem>>, %arg3: memref<64x128xbf16, #tpu.memory_space<vmem>>, %arg4: memref<64x128xbf16, #tpu.memory_space<vmem>>, %arg5: memref<128x128xbf16, #tpu.memory_space<vmem>>, %arg6: memref<128x128xbf16, #tpu.memory_space<vmem>>, %arg7: memref<1x128xf32, #tpu.memory_space<vmem>>, %arg8: memref<1x128xf32, #tpu.memory_space<vmem>>, %arg9: memref<1x128xf32, #tpu.memory_space<vmem>>, %arg10: memref<1x128xf32, #tpu.memory_space<vmem>>, %arg11: memref<128x128xf32, #tpu.memory_space<vmem>>, %arg12: memref<4x1x128xf32, #tpu.memory_space<vmem>>) attributes {dimension_semantics = [#tpu.dimension_semantics<parallel>], iteration_bounds = array<i64: 2>, scalar_prefetch = 0 : i64, scratch_operands = 0 : i64, tpu.core_type = #tpu.core_type<tc>, window_params = [{transform_indices = @transform_0, window_bounds = array<i64: 4, 64, 64>}, {transform_indices = @transform_1, window_bounds = array<i64: 4, 64, 128>}, {pipeline_mode = #tpu.pipeline_mode<synchronous>, transform_indices = @transform_2, window_bounds = array<i64: 64, 128>}, {pipeline_mode = #tpu.pipeline_mode<synchronous>, transform_indices = @transform_3, window_bounds = array<i64: 64, 128>}, {pipeline_mode = #tpu.pipeline_mode<synchronous>, transform_indices = @transform_4, window_bounds = array<i64: 128, 128>}, {pipeline_mode = #tpu.pipeline_mode<synchronous>, transform_indices = @transform_5, window_bounds = array<i64: 128, 128>}, {pipeline_mode = #tpu.pipeline_mode<synchronous>, transform_indices = @transform_6, window_bounds = array<i64: 1, 128>}, {pipeline_mode = #tpu.pipeline_mode<synchronous>, transform_indices = @transform_7, window_bounds = array<i64: 1, 128>}, {pipeline_mode = #tpu.pipeline_mode<synchronous>, transform_indices = @transform_8, window_bounds = array<i64: 1, 128>}, {pipeline_mode = #tpu.pipeline_mode<synchronous>, transform_indices = @transform_9, window_bounds = array<i64: 1, 128>}, {pipeline_mode = #tpu.pipeline_mode<synchronous>, transform_indices = @transform_10, window_bounds = array<i64: 128, 128>}, {transform_indices = @transform_11, window_bounds = array<i64: 4, 1, 128>}]} {
    %c0 = arith.constant 0 : index
    %c0_0 = arith.constant 0 : index
    %c0_1 = arith.constant 0 : index
    %0 = vector.load %arg1[%c0, %c0_0, %c0_1] : memref<4x64x64xf32, #tpu.memory_space<vmem>>, vector<4x64x64xf32>
    %c0_2 = arith.constant 0 : index
    %c0_3 = arith.constant 0 : index
    %c0_4 = arith.constant 0 : index
    %1 = vector.load %arg2[%c0_2, %c0_3, %c0_4] : memref<4x64x128xf32, #tpu.memory_space<vmem>>, vector<4x64x128xf32>
    %c0_5 = arith.constant 0 : index
    %c0_6 = arith.constant 0 : index
    %2 = vector.load %arg11[%c0_5, %c0_6] : memref<128x128xf32, #tpu.memory_space<vmem>>, vector<128x128xf32>
    %3 = vector.shape_cast %0 : vector<4x64x64xf32> to vector<256x64xf32>
    %4 = arith.truncf %3 : vector<256x64xf32> to vector<256x64xbf16>
    %5 = vector.shape_cast %1 : vector<4x64x128xf32> to vector<256x128xf32>
    %6 = arith.truncf %5 : vector<256x128xf32> to vector<256x128xbf16>
    %c0_7 = arith.constant 0 : index
    %c0_8 = arith.constant 0 : index
    %7 = vector.load %arg4[%c0_7, %c0_8] : memref<64x128xbf16, #tpu.memory_space<vmem>>, vector<64x128xbf16>
    %cst = arith.constant dense<0.000000e+00> : vector<256x128xf32>
    %8 = tpu.matmul %4, %7, %cst {dimension_numbers = #tpu.dot_dimension_numbers<[1], [0], [0], [1], [0, 0, 1, 1], [], []>} : vector<256x64xbf16>, vector<64x128xbf16>, vector<256x128xf32> -> vector<256x128xf32>
    %c0_9 = arith.constant 0 : index
    %c0_10 = arith.constant 0 : index
    %9 = vector.load %arg5[%c0_9, %c0_10] : memref<128x128xbf16, #tpu.memory_space<vmem>>, vector<128x128xbf16>
    %cst_11 = arith.constant dense<0.000000e+00> : vector<256x128xf32>
    %10 = tpu.matmul %6, %9, %cst_11 {dimension_numbers = #tpu.dot_dimension_numbers<[1], [0], [0], [1], [0, 0, 1, 1], [], []>} : vector<256x128xbf16>, vector<128x128xbf16>, vector<256x128xf32> -> vector<256x128xf32>
    %11 = arith.addf %8, %10 : vector<256x128xf32>
    %12 = vector.shape_cast %11 : vector<256x128xf32> to vector<4x64x128xf32>
    %cst_12 = arith.constant dense<0xFF800000> : vector<4x64xf32>
    %13 = vector.multi_reduction <maximumf>, %0, %cst_12 [1] : vector<4x64x64xf32> to vector<4x64xf32>
    %14 = arith.truncf %13 : vector<4x64xf32> to vector<4x64xbf16>
    %c0_13 = arith.constant 0 : index
    %c0_14 = arith.constant 0 : index
    %15 = vector.load %arg3[%c0_13, %c0_14] : memref<64x128xbf16, #tpu.memory_space<vmem>>, vector<64x128xbf16>
    %cst_15 = arith.constant dense<0.000000e+00> : vector<4x128xf32>
    %16 = tpu.matmul %14, %15, %cst_15 {dimension_numbers = #tpu.dot_dimension_numbers<[1], [0], [0], [1], [0, 0, 1, 1], [], []>} : vector<4x64xbf16>, vector<64x128xbf16>, vector<4x128xf32> -> vector<4x128xf32>
    %c0_16 = arith.constant 0 : index
    %c0_17 = arith.constant 0 : index
    %17 = vector.load %arg7[%c0_16, %c0_17] : memref<1x128xf32, #tpu.memory_space<vmem>>, vector<1x128xf32>
    %c0_18 = arith.constant 0 : index
    %c0_19 = arith.constant 0 : index
    %18 = vector.load %arg8[%c0_18, %c0_19] : memref<1x128xf32, #tpu.memory_space<vmem>>, vector<1x128xf32>
    %cst_20 = arith.constant dense<0.000000e+00> : vector<4x128xf32>
    %19 = vector.multi_reduction <add>, %12, %cst_20 [1] : vector<4x64x128xf32> to vector<4x128xf32>
    %20 = arith.mulf %12, %12 : vector<4x64x128xf32>
    %cst_21 = arith.constant dense<0.000000e+00> : vector<4x128xf32>
    %21 = vector.multi_reduction <add>, %20, %cst_21 [1] : vector<4x64x128xf32> to vector<4x128xf32>
    %cst_22 = arith.constant 2.000000e+00 : f32
    %22 = vector.broadcast %cst_22 : f32 to vector<4x128xf32>
    %23 = arith.mulf %22, %16 : vector<4x128xf32>
    %24 = arith.mulf %23, %19 : vector<4x128xf32>
    %25 = arith.addf %21, %24 : vector<4x128xf32>
    %26 = arith.mulf %16, %16 : vector<4x128xf32>
    %cst_23 = arith.constant 6.400000e+01 : f32
    %27 = vector.broadcast %cst_23 : f32 to vector<4x128xf32>
    %28 = arith.mulf %27, %26 : vector<4x128xf32>
    %29 = arith.addf %25, %28 : vector<4x128xf32>
    %cst_24 = arith.constant 6.400000e+01 : f32
    %30 = vector.broadcast %cst_24 : f32 to vector<4x128xf32>
    %31 = arith.mulf %30, %16 : vector<4x128xf32>
    %32 = arith.addf %19, %31 : vector<4x128xf32>
    %cst_25 = arith.constant dense<0.000000e+00> : vector<4x128xf32>
    %33 = tpu.matmul %32, %2, %cst_25 {dimension_numbers = #tpu.dot_dimension_numbers<[1], [0], [0], [1], [0, 0, 1, 1], [], []>} : vector<4x128xf32>, vector<128x128xf32>, vector<4x128xf32> -> vector<4x128xf32>
    %cst_26 = arith.constant dense<0.000000e+00> : vector<4x128xf32>
    %34 = tpu.matmul %29, %2, %cst_26 {dimension_numbers = #tpu.dot_dimension_numbers<[1], [0], [0], [1], [0, 0, 1, 1], [], []>} : vector<4x128xf32>, vector<128x128xf32>, vector<4x128xf32> -> vector<4x128xf32>
    %35 = arith.mulf %33, %33 : vector<4x128xf32>
    %36 = arith.subf %34, %35 : vector<4x128xf32>
    %cst_27 = arith.constant 0.000000e+00 : f32
    %37 = vector.broadcast %cst_27 : f32 to vector<4x128xf32>
    %38 = arith.maximumf %36, %37 : vector<4x128xf32>
    %cst_28 = arith.constant 9.99999974E-6 : f32
    %39 = vector.broadcast %cst_28 : f32 to vector<4x128xf32>
    %40 = arith.addf %38, %39 : vector<4x128xf32>
    %41 = math.rsqrt %40 : vector<4x128xf32>
    %42 = vector.broadcast %17 : vector<1x128xf32> to vector<4x128xf32>
    %43 = arith.mulf %42, %41 : vector<4x128xf32>
    %44 = arith.mulf %33, %43 : vector<4x128xf32>
    %45 = vector.broadcast %18 : vector<1x128xf32> to vector<4x128xf32>
    %46 = arith.subf %45, %44 : vector<4x128xf32>
    %47 = arith.mulf %16, %43 : vector<4x128xf32>
    %48 = arith.addf %46, %47 : vector<4x128xf32>
    %49 = vector.shape_cast %43 : vector<4x128xf32> to vector<4x1x128xf32>
    %50 = vector.broadcast %49 : vector<4x1x128xf32> to vector<4x64x128xf32>
    %51 = arith.mulf %12, %50 : vector<4x64x128xf32>
    %52 = vector.shape_cast %48 : vector<4x128xf32> to vector<4x1x128xf32>
    %53 = vector.broadcast %52 : vector<4x1x128xf32> to vector<4x64x128xf32>
    %54 = arith.addf %51, %53 : vector<4x64x128xf32>
    %cst_29 = arith.constant 0.000000e+00 : f32
    %55 = vector.broadcast %cst_29 : f32 to vector<4x64x128xf32>
    %56 = arith.cmpf oge, %54, %55 : vector<4x64x128xf32>
    %cst_30 = arith.constant 1.000000e-01 : f32
    %57 = vector.broadcast %cst_30 : f32 to vector<4x64x128xf32>
    %58 = arith.mulf %57, %54 : vector<4x64x128xf32>
    %59 = arith.select %56, %54, %58 : vector<4x64x128xi1>, vector<4x64x128xf32>
    %60 = vector.shape_cast %59 : vector<4x64x128xf32> to vector<256x128xf32>
    %61 = arith.truncf %60 : vector<256x128xf32> to vector<256x128xbf16>
    %c0_31 = arith.constant 0 : index
    %c0_32 = arith.constant 0 : index
    %62 = vector.load %arg6[%c0_31, %c0_32] : memref<128x128xbf16, #tpu.memory_space<vmem>>, vector<128x128xbf16>
    %cst_33 = arith.constant dense<0.000000e+00> : vector<256x128xf32>
    %63 = tpu.matmul %61, %62, %cst_33 {dimension_numbers = #tpu.dot_dimension_numbers<[1], [0], [0], [1], [0, 0, 1, 1], [], []>} : vector<256x128xbf16>, vector<128x128xbf16>, vector<256x128xf32> -> vector<256x128xf32>
    %64 = vector.shape_cast %63 : vector<256x128xf32> to vector<4x64x128xf32>
    %c0_34 = arith.constant 0 : index
    %c0_35 = arith.constant 0 : index
    %65 = vector.load %arg9[%c0_34, %c0_35] : memref<1x128xf32, #tpu.memory_space<vmem>>, vector<1x128xf32>
    %c0_36 = arith.constant 0 : index
    %c0_37 = arith.constant 0 : index
    %66 = vector.load %arg10[%c0_36, %c0_37] : memref<1x128xf32, #tpu.memory_space<vmem>>, vector<1x128xf32>
    %cst_38 = arith.constant dense<0.000000e+00> : vector<4x128xf32>
    %67 = vector.multi_reduction <add>, %64, %cst_38 [1] : vector<4x64x128xf32> to vector<4x128xf32>
    %68 = arith.mulf %64, %64 : vector<4x64x128xf32>
    %cst_39 = arith.constant dense<0.000000e+00> : vector<4x128xf32>
    %69 = vector.multi_reduction <add>, %68, %cst_39 [1] : vector<4x64x128xf32> to vector<4x128xf32>
    %cst_40 = arith.constant dense<0.000000e+00> : vector<4x128xf32>
    %70 = tpu.matmul %67, %2, %cst_40 {dimension_numbers = #tpu.dot_dimension_numbers<[1], [0], [0], [1], [0, 0, 1, 1], [], []>} : vector<4x128xf32>, vector<128x128xf32>, vector<4x128xf32> -> vector<4x128xf32>
    %cst_41 = arith.constant dense<0.000000e+00> : vector<4x128xf32>
    %71 = tpu.matmul %69, %2, %cst_41 {dimension_numbers = #tpu.dot_dimension_numbers<[1], [0], [0], [1], [0, 0, 1, 1], [], []>} : vector<4x128xf32>, vector<128x128xf32>, vector<4x128xf32> -> vector<4x128xf32>
    %72 = arith.mulf %70, %70 : vector<4x128xf32>
    %73 = arith.subf %71, %72 : vector<4x128xf32>
    %cst_42 = arith.constant 0.000000e+00 : f32
    %74 = vector.broadcast %cst_42 : f32 to vector<4x128xf32>
    %75 = arith.maximumf %73, %74 : vector<4x128xf32>
    %cst_43 = arith.constant 9.99999974E-6 : f32
    %76 = vector.broadcast %cst_43 : f32 to vector<4x128xf32>
    %77 = arith.addf %75, %76 : vector<4x128xf32>
    %78 = math.rsqrt %77 : vector<4x128xf32>
    %79 = vector.broadcast %65 : vector<1x128xf32> to vector<4x128xf32>
    %80 = arith.mulf %79, %78 : vector<4x128xf32>
    %81 = arith.mulf %70, %80 : vector<4x128xf32>
    %82 = vector.broadcast %66 : vector<1x128xf32> to vector<4x128xf32>
    %83 = arith.subf %82, %81 : vector<4x128xf32>
    %84 = vector.shape_cast %80 : vector<4x128xf32> to vector<4x1x128xf32>
    %85 = vector.broadcast %84 : vector<4x1x128xf32> to vector<4x64x128xf32>
    %86 = arith.mulf %64, %85 : vector<4x64x128xf32>
    %87 = vector.shape_cast %83 : vector<4x128xf32> to vector<4x1x128xf32>
    %88 = vector.broadcast %87 : vector<4x1x128xf32> to vector<4x64x128xf32>
    %89 = arith.addf %86, %88 : vector<4x64x128xf32>
    %cst_44 = arith.constant 0.000000e+00 : f32
    %90 = vector.broadcast %cst_44 : f32 to vector<4x64x128xf32>
    %91 = arith.cmpf oge, %89, %90 : vector<4x64x128xf32>
    %cst_45 = arith.constant 1.000000e-01 : f32
    %92 = vector.broadcast %cst_45 : f32 to vector<4x64x128xf32>
    %93 = arith.mulf %92, %89 : vector<4x64x128xf32>
    %94 = arith.select %91, %89, %93 : vector<4x64x128xi1>, vector<4x64x128xf32>
    %cst_46 = arith.constant dense<0xFF800000> : vector<4x128xf32>
    %95 = vector.multi_reduction <maximumf>, %94, %cst_46 [1] : vector<4x64x128xf32> to vector<4x128xf32>
    %cst_47 = arith.constant 0.000000e+00 : f32
    %96 = vector.broadcast %cst_47 : f32 to vector<4x128xf32>
    %97 = arith.maximumf %95, %96 : vector<4x128xf32>
    %98 = vector.shape_cast %97 : vector<4x128xf32> to vector<4x1x128xf32>
    %c0_48 = arith.constant 0 : index
    %c0_49 = arith.constant 0 : index
    %c0_50 = arith.constant 0 : index
    %99 = vector.load %arg12[%c0_48, %c0_49, %c0_50] : memref<4x1x128xf32, #tpu.memory_space<vmem>>, vector<4x1x128xf32>
    tpu.vector_store %arg12[%c0_48, %c0_49, %c0_50], %98 {strides = array<i32>} : memref<4x1x128xf32, #tpu.memory_space<vmem>>, vector<4x1x128xf32>,
    return
  }
  func.func @transform_0(%arg0: i32) -> (i32, i32, i32) {
    %c0_i32 = arith.constant 0 : i32
    %c0_i32_0 = arith.constant 0 : i32
    %c0_i32_1 = arith.constant 0 : i32
    return %arg0, %c0_i32, %c0_i32_0 : i32, i32, i32
  }
  func.func @transform_1(%arg0: i32) -> (i32, i32, i32) {
    %c0_i32 = arith.constant 0 : i32
    %c0_i32_0 = arith.constant 0 : i32
    %c0_i32_1 = arith.constant 0 : i32
    return %arg0, %c0_i32, %c0_i32_0 : i32, i32, i32
  }
  func.func @transform_2(%arg0: i32) -> (i32, i32) {
    %c0_i32 = arith.constant 0 : i32
    %c0_i32_0 = arith.constant 0 : i32
    %c0_i32_1 = arith.constant 0 : i32
    return %c0_i32, %c0_i32_0 : i32, i32
  }
  func.func @transform_3(%arg0: i32) -> (i32, i32) {
    %c0_i32 = arith.constant 0 : i32
    %c0_i32_0 = arith.constant 0 : i32
    %c0_i32_1 = arith.constant 0 : i32
    return %c0_i32, %c0_i32_0 : i32, i32
  }
  func.func @transform_4(%arg0: i32) -> (i32, i32) {
    %c0_i32 = arith.constant 0 : i32
    %c0_i32_0 = arith.constant 0 : i32
    %c0_i32_1 = arith.constant 0 : i32
    return %c0_i32, %c0_i32_0 : i32, i32
  }
  func.func @transform_5(%arg0: i32) -> (i32, i32) {
    %c0_i32 = arith.constant 0 : i32
    %c0_i32_0 = arith.constant 0 : i32
    %c0_i32_1 = arith.constant 0 : i32
    return %c0_i32, %c0_i32_0 : i32, i32
  }
  func.func @transform_6(%arg0: i32) -> (i32, i32) {
    %c0_i32 = arith.constant 0 : i32
    %c0_i32_0 = arith.constant 0 : i32
    %c0_i32_1 = arith.constant 0 : i32
    return %c0_i32, %c0_i32_0 : i32, i32
  }
  func.func @transform_7(%arg0: i32) -> (i32, i32) {
    %c0_i32 = arith.constant 0 : i32
    %c0_i32_0 = arith.constant 0 : i32
    %c0_i32_1 = arith.constant 0 : i32
    return %c0_i32, %c0_i32_0 : i32, i32
  }
  func.func @transform_8(%arg0: i32) -> (i32, i32) {
    %c0_i32 = arith.constant 0 : i32
    %c0_i32_0 = arith.constant 0 : i32
    %c0_i32_1 = arith.constant 0 : i32
    return %c0_i32, %c0_i32_0 : i32, i32
  }
  func.func @transform_9(%arg0: i32) -> (i32, i32) {
    %c0_i32 = arith.constant 0 : i32
    %c0_i32_0 = arith.constant 0 : i32
    %c0_i32_1 = arith.constant 0 : i32
    return %c0_i32, %c0_i32_0 : i32, i32
  }
  func.func @transform_10(%arg0: i32) -> (i32, i32) {
    %c0_i32 = arith.constant 0 : i32
    %c0_i32_0 = arith.constant 0 : i32
    %c0_i32_1 = arith.constant 0 : i32
    return %c0_i32, %c0_i32_0 : i32, i32
  }
  func.func @transform_11(%arg0: i32) -> (i32, i32, i32) {
    %c0_i32 = arith.constant 0 : i32
    %c0_i32_0 = arith.constant 0 : i32
    %c0_i32_1 = arith.constant 0 : i32
    return %arg0, %c0_i32, %c0_i32_0 : i32, i32, i32
  }
}

</mosaic_0001>

<bundles_post_ra>
// kernel: tpu_custom_call.1
= control target key start
LH: loop header
LB: loop body
LE: loop exit
PB: predicated region body
PF: predicated region fallthrough
CT: control target
= control target key end

     0   :  { %s5449_s0 = inlined_call_operand.hbm [shape: f32[8,64,64], index: 0, kind: input, shape index: {}]   ;;  %s5450_s1 = inlined_call_operand.hbm [shape: f32[8,64,128], index: 1, kind: input, shape index: {}]   ;;  %s5451_s2 = inlined_call_operand.hbm [shape: bf16[64,128], index: 2, kind: input, shape index: {}]   ;;  %s5452_s3 = inlined_call_operand.hbm [shape: bf16[64,128], index: 3, kind: input, shape index: {}]   ;;  %s5453_s4 = inlined_call_operand.hbm [shape: bf16[128,128], index: 4, kind: input, shape index: {}]   ;;  %s5454_s5 = inlined_call_operand.hbm [shape: bf16[128,128], index: 5, kind: input, shape index: {}]   ;;  %s5455_s6 = inlined_call_operand.vmem [shape: f32[1,128], index: 6, kind: input, shape index: {}]   ;;  %s5456_s7 = inlined_call_operand.vmem [shape: f32[1,128], index: 7, kind: input, shape index: {}]   ;;  %s5457_s8 = inlined_call_operand.vmem [shape: f32[1,128], index: 8, kind: input, shape index: {}]   ;;  %s5458_s9 = inlined_call_operand.vmem [shape: f32[1,128], index: 9, kind: input, shape index: {}]   ;;  %s5459_s10 = inlined_call_operand.hbm [shape: f32[128,128], index: 10, kind: input, shape index: {}]   ;;  %s5460_s11 = inlined_call_operand.hbm [shape: f32[8,1,128], index: 11, kind: output, shape index: {}]  }
   0x1   :  { %5494 = sst [smem:[#allocation45_spill]] %s5449_s0 }
   0x2   :  { %5495 = sst [smem:[#allocation46_spill]] %s5451_s2 }
   0x3   :  { %5496 = sst [smem:[#allocation47_spill]] %s5452_s3 }
   0x4   :  { %5497 = sst [smem:[#allocation48_spill]] %s5453_s4 }
   0x5   :  { %5498 = sst [smem:[#allocation49_spill]] %s5454_s5 }
   0x6   :  { %5499 = sst [smem:[#allocation50_spill]] %s5459_s10 }
   0x7   :  { %16 = vsyncpa [#allocation3], 0 }
   0x8   :  { %18 = vsyncpa [#allocation3 + $0x1], 0 }
   0x9   :  { %19 = vsyncpa [#allocation6], 0 }
   0xa   :  { %21 = vsyncpa [#allocation6 + $0x1], 0 }
   0xb   :  { %22 = vsyncpa [#allocation9], 0 }
   0xc   :  { %23 = vsyncpa [#allocation12], 0 }
   0xd   :  { %24 = vsyncpa [#allocation4], 0 }
   0xe   :  { %26 = vsyncpa [#allocation4 + $0x1], 0  ;;  %s3932_s17 = smov 0   ;;  %s3934_s18 = smov 0  }
   0xf   :  { %s3936_s19 = smov 0   ;;  %s3938_s20 = smov 0  }
  0x10 LB: > { %5500 = sst [smem:[#allocation21_spill]] %s3849_s19  ;;  %s3855_s21 = smov [#allocation7]   ;;  %s3853_s20 = sphi %s3938_s20, %s5578_s20   ;;  %s3849_s19 = sphi %s3936_s19, %s5580_s19   ;;  %s3845_s18 = sphi %s3934_s18, %s5582_s18   ;;  %s3841_s17 = sphi %s3932_s17, %s5581_s17  }
  0x11   : > { %s316_s22 = sshll.u32 %s3855_s21, 4  ;;  %s3953_s23 = sadd.s32 4294967295, %s3853_s20   ;;  %s317_s22 = int_to_ptr.vmem [resolvable:$true] %s316_s22 }
  0x12   : > { %p2924_p0 = scmp.ge.s32.totalorder %s3853_s20, 1  ;;  %p5468_p1 = scmp.eq.s32.totalorder %s3953_s23, 0 }
  0x13   : > { %p304_p2 = scmp.lt.s32.totalorder %s3853_s20, 3  ;;  %s3856_s25 = smov [#allocation8]  }
  0x14   : > { %s329_s26 = sshll.u32 %s3856_s25, 4  ;;  %s3857_s28 = smov [#allocation11]   ;;  %s3971_s26 = int_to_ptr.vmem [resolvable:$true] %s329_s26 }
  0x15   : > { %p3958_p3 = pnand %p2924_p0, %p304_p2  ;;  %s355_s29 = sshll.u32 %s3857_s28, 4  ;;  %s3973_s29 = int_to_ptr.vmem [resolvable:$true] %s355_s29 }
  0x16   : > { %s3598_s12 = scalar_lea.vmem %s317_s22, 512  ;;  %p3606_p11 = scmp.lt.s32.totalorder %s317_s22, %s317_s22 }
  0x17   : > { %p3458_p5 = pneg %p3958_p3  ;;  %p3599_p8 = scmp.ne.s32.totalorder %s317_s22, %s3598_s12 }
  0x18   : > { %p3607_p12 = scmp.lt.s32.totalorder %s3598_s12, %s3598_s12 }
  0x19   : > { %p3967_p6 = pnand %p3458_p5, %p5468_p1 }
  0x1a   : > { %p3608_p13 = por %p3607_p12, %p3606_p11 }
  0x1b   : > { %p3977_p7 = pneg %p3967_p6 }
  0x1d   : > { %p3601_p9 = pnand %p3599_p8, %p3977_p7 }
  0x1f   : > { %p3602_p10 = pneg %p3601_p9 }
  0x21   : > { %p3609_p0 = pnand %p3608_p13, %p3602_p10 }
  0x23   : > { %3612 = shalt.err (!%p3609_p0)
}
  0x24   : > { %s3858_s13 = smov 64   ;;  %s3859_s14 = smov 4  }
  0x25   : > { %s5504_s2 = sld [smem:[#allocation46_spill]]  ;;  %s3624_s21 = scalar_lea.vmem %s3971_s26, 512 }
  0x26   : > { %p3625_p2 = scmp.ne.s32.totalorder %s3971_s26, %s3624_s21  ;;  %p3632_p9 = scmp.lt.s32.totalorder %s3971_s26, %s3971_s26 }
  0x27   : > { %p3633_p10 = scmp.lt.s32.totalorder %s3624_s21, %s3624_s21 }
  0x28   : > { %p3627_p5 = pnand %p3625_p2, %p3977_p7 }
  0x29   : > { %p3634_p11 = por %p3633_p10, %p3632_p9 }
  0x2a   : > { %p3628_p8 = pneg %p3627_p5 }
  0x2b   : > { %3461 = dma.hbm_to_vmem [thread:$0]  (!%p3967_p6), %s5504_s2, 512, %s317_s22, [#allocation6], %s3858_s13, %s3858_s13, %s3859_s14  }
  0x2c   : > { %p3635_p12 = pnand %p3634_p11, %p3628_p8 }
  0x2e   : > { %3638 = shalt.err (!%p3635_p12)
}
  0x2f   : > { %s5505_s3 = sld [smem:[#allocation47_spill]]  ;;  %s3650_s22 = scalar_lea.vmem %s3973_s29, 1024 }
  0x30   : > { %p3651_p13 = scmp.ne.s32.totalorder %s3973_s29, %s3650_s22  ;;  %p3658_p5 = scmp.lt.s32.totalorder %s3973_s29, %s3973_s29 }
  0x31   : > { %p3659_p8 = scmp.lt.s32.totalorder %s3650_s22, %s3650_s22 }
  0x32   : > { %p3653_p0 = pnand %p3651_p13, %p3977_p7 }
  0x33   : > { %p3660_p9 = por %p3659_p8, %p3658_p5 }
  0x34   : > { %p3654_p2 = pneg %p3653_p0 }
  0x35   : > { %3464 = dma.hbm_to_vmem [thread:$0]  (!%p3967_p6), %s5505_s3, 512, %s3971_s26, [#allocation9], %s3858_s13, %s3858_s13, %s3859_s14  }
  0x36   : > { %p3661_p10 = pnand %p3660_p9, %p3654_p2 }
  0x38   : > { %3664 = shalt.err (!%p3661_p10)
}
  0x39   : > { %s5506_s5 = sld [smem:[#allocation49_spill]]  ;;  %s3860_s26 = smov [#allocation10]  }
  0x3a   : > { %s342_s16 = sshll.u32 %s3860_s26, 4  ;;  %s3861_s21 = smov [#allocation13]   ;;  %s343_s16 = int_to_ptr.vmem [resolvable:$true] %s342_s16 }
  0x3b   : > { %s380_s25 = sshll.u32 %s3861_s21, 4  ;;  %s3676_s28 = scalar_lea.vmem %s343_s16, 1024  ;;  %s381_s25 = int_to_ptr.vmem [resolvable:$true] %s380_s25 }
  0x3c   : > { %p3677_p11 = scmp.ne.s32.totalorder %s343_s16, %s3676_s28  ;;  %p3684_p0 = scmp.lt.s32.totalorder %s343_s16, %s343_s16 }
  0x3d   : > { %p3685_p2 = scmp.lt.s32.totalorder %s3676_s28, %s3676_s28 }
  0x3e   : > { %p3679_p12 = pnand %p3677_p11, %p3977_p7 }
  0x3f   : > { %3470 = dma.hbm_to_vmem [thread:$0]  (!%p3967_p6), %s5506_s5, 1024, %s3973_s29, [#allocation12], %s3858_s13, %s3858_s13, %s3859_s14  }
  0x40   : > { %p3680_p13 = pneg %p3679_p12  ;;  %p3686_p5 = por %p3685_p2, %p3684_p0 }
  0x42   : > { %p3687_p8 = pnand %p3686_p5, %p3680_p13 }
  0x44   : > { %3690 = shalt.err (!%p3687_p8)
}
  0x45   : > { %s5507_s4 = sld [smem:[#allocation48_spill]]  ;;  %s3702_s12 = scalar_lea.vmem %s381_s25, 2048 }
  0x46   : > { %p3703_p9 = scmp.ne.s32.totalorder %s381_s25, %s3702_s12  ;;  %p3710_p12 = scmp.lt.s32.totalorder %s381_s25, %s381_s25 }
  0x47   : > { %p3711_p0 = scmp.lt.s32.totalorder %s3702_s12, %s3702_s12 }
  0x48   : > { %p3705_p10 = pnand %p3703_p9, %p3977_p7 }
  0x49   : > { %p3712_p13 = por %p3711_p0, %p3710_p12 }
  0x4a   : > { %p3706_p11 = pneg %p3705_p10 }
  0x4b   : > { %3467 = dma.hbm_to_vmem [thread:$0]  (!%p3967_p6), %s5507_s4, 1024, %s343_s16, [#allocation9], %s3858_s13, %s3858_s13, %s3859_s14  }
  0x4c   : > { %p3713_p2 = pnand %p3712_p13, %p3706_p11 }
  0x4e   : > { %3716 = shalt.err (!%p3713_p2)
}
  0x4f   : > { %s5461_s15 = smov 128   ;;  %s5463_s30 = smov 8  }
  0x50   : > { %s5508_s10 = sld [smem:[#allocation50_spill]]  ;;  %s2923_s26 = sadd.s32 4294967294, %s3853_s20  }
  0x51   : > { %s4043_s16 = sadd.s32 1, %s3853_s20   ;;  %s39_s21 = sadd.s32 1, %s3849_s19 }
  0x52   : > { %5509 = sst [smem:[#allocation22_spill]] %s4043_s16  ;;  %s36_s28 = ssub.s32 %s3853_s20, %s4043_s16 }
  0x53   : > { %p46_p7 = scmp.ne.s32.totalorder %s3849_s19, %s3845_s18  ;;  %p37_p5 = scmp.eq.s32.totalorder %s36_s28, 0 }
  0x54   : > { %p47_p8 = scmp.eq.s32.totalorder %s3853_s20, 0  ;;  %p52_p9 = scmp.ne.s32.totalorder %s3845_s18, %s3841_s17 }
  0x55   : > { %p291_p10 = scmp.eq.s32.totalorder %s3953_s23, 1  ;;  %p297_p0 = scmp.eq.s32.totalorder %s2923_s26, 1 }
  0x56   : > { %3473 = dma.hbm_to_vmem [thread:$0]  (!%p3967_p6), %s5508_s10, 2048, %s381_s25, [#allocation12], %s5461_s15, %s5461_s15, %s5463_s30  }
  0x57   : > { %s4055_s27 = scalar_select %p37_p5, %s3849_s19, %s39_s21  }
  0x58   : > { %p48_p11 = por %p47_p8, %p46_p7  ;;  %p4059_p12 = por %p5468_p1, %p52_p9 }
  0x59   : > { %5510 = sst [smem:[#allocation23_spill]] %s4055_s27  ;;  %p4063_p6 = por %p291_p10, %p46_p7 }
  0x5a   : > { %s5511_s29 = scalar_select %p4059_p12, 1, 0 }
  0x5b   : > { %s5512_s25 = scalar_select %p4063_p6, 1, 0 }
  0x5c   : > { %p3490_p13 = scmp.lt.s32.totalorder %s3853_s20, 2  ;;  %s394_s22 = sand.u32 1, %s3849_s19  }
  0x5d   : > { %p4069_p2 = por %p297_p0, %p52_p9  ;;  %s4073_s13 = sshll.u32 %s394_s22, 8 }
  0x5e   : > { %s2999_s14 = sshll.u32 %s3853_s20, 12  ;;  %s5515_s0 = sld [smem:[#allocation45_spill]] }
  0x5f   : > { %s5513_s12 = scalar_select %p4069_p2, 1, 0 }
  0x60   : > { %s398_s30 = scalar_lea.vmem [#allocation2], %s4073_s13  ;;  %p4082_p7 = pnand %p3490_p13, %p48_p11 }
  0x61   : > { %5514 = sst [smem:[#allocation24_spill]] %s5513_s12  ;;  %s406_s26 = sshll.u32 %s398_s30, 4  ;;  %s4086_s26 = int_to_ptr.vmem [resolvable:$true] %s406_s26 }
  0x62   : > { %s4091_s5 = scalar_lea.hbm %s5450_s1, %s2999_s14  ;;  %s4093_s21 = scalar_lea.sflag [#allocation3], %s394_s22 }
  0x63   : > { %p3719_p8 = pneg %p4082_p7 }
  0x64   : > { %s4079_s15 = scalar_lea.hbm %s5515_s0, %s2999_s14  ;;  %s3722_s27 = scalar_lea.hbm %s5515_s0, 8192 }
  0x65   : > { %s3717_s28 = scalar_lea.hbm %s4079_s15, 4096  ;;  %p3723_p11 = scmp.lt.s32.totalorder %s4079_s15, %s5515_s0 }
  0x66   : > { %p3718_p5 = scmp.ne.s32.totalorder %s4079_s15, %s3717_s28  ;;  %p3724_p0 = scmp.lt.s32.totalorder %s3722_s27, %s3717_s28 }
  0x68   : > { %p3720_p9 = pnand %p3719_p8, %p3718_p5  ;;  %p3725_p13 = por %p3724_p0, %p3723_p11 }
  0x6a   : > { %p3721_p10 = pneg %p3720_p9 }
  0x6c   : > { %p3726_p4 = pnand %p3725_p13, %p3721_p10 }
  0x6e   : > { %3729 = shalt.err (!%p3726_p4)
}
  0x6f   : > { %s3730_s3 = scalar_lea.vmem %s4086_s26, 4096  ;;  %s3864_s4 = smov [#allocation2]  }
  0x70   : > { %p3731_p1 = scmp.ne.s32.totalorder %s4086_s26, %s3730_s3  ;;  %s3735_s10 = sshll.u32 %s3864_s4, 4  ;;  %s3736_s10 = int_to_ptr.vmem [resolvable:$false] %s3735_s10 }
  0x71   : > { %s3737_s22 = scalar_lea.vmem %s3736_s10, 8192  ;;  %p3738_p2 = scmp.lt.s32.totalorder %s4086_s26, %s3736_s10 }
  0x72   : > { %p3733_p5 = pnand %p3731_p1, %p3719_p8  ;;  %p3739_p6 = scmp.lt.s32.totalorder %s3737_s22, %s3730_s3 }
  0x74   : > { %p3734_p9 = pneg %p3733_p5  ;;  %p3740_p12 = por %p3739_p6, %p3738_p2 }
  0x76   : > { %p3741_p11 = pnand %p3740_p12, %p3734_p9 }
  0x78   : > { %3744 = shalt.err (!%p3741_p11)
}
  0x79   : > { %s5517_s19 = smov 8   ;;  %s5518_s16 = smov 128  }
  0x7a   : > { %3477 = dma.hbm_to_vmem [thread:$0]  (!%p4082_p7), %s4079_s15, 4096, %s4086_s26, %s4093_s21, %s5518_s16, %s5518_s16, %s5517_s19  }
  0x7b   : > { %s420_s27 = scalar_lea.vmem [#allocation5], %s4073_s13  ;;  %s416_s28 = sand.u32 1, %s3853_s20  }
  0x7c   : > { %s428_s14 = sshll.u32 %s420_s27, 4  ;;  %s417_s30 = scalar_lea.sflag [#allocation6], %s416_s28  ;;  %s4125_s14 = int_to_ptr.vmem [resolvable:$true] %s428_s14 }
  0x7d   : > { %s3745_s3 = scalar_lea.hbm %s4091_s5, 4096  ;;  %s3750_s22 = scalar_lea.hbm %s5450_s1, 8192 }
  0x7e   : > { %p3746_p1 = scmp.ne.s32.totalorder %s4091_s5, %s3745_s3  ;;  %p3751_p6 = scmp.lt.s32.totalorder %s4091_s5, %s5450_s1 }
  0x7f   : > { %p3752_p2 = scmp.lt.s32.totalorder %s3750_s22, %s3745_s3 }
  0x80   : > { %p3748_p4 = pnand %p3746_p1, %p3719_p8 }
  0x81   : > { %p3753_p10 = por %p3752_p2, %p3751_p6 }
  0x82   : > { %p3749_p12 = pneg %p3748_p4 }
  0x84   : > { %p3754_p0 = pnand %p3753_p10, %p3749_p12 }
  0x86   : > { %3757 = shalt.err (!%p3754_p0)
}
  0x87   : > { %s3758_s15 = scalar_lea.vmem %s4125_s14, 4096  ;;  %s3865_s13 = smov [#allocation5]  }
  0x88   : > { %p3759_p13 = scmp.ne.s32.totalorder %s4125_s14, %s3758_s15  ;;  %s3763_s26 = sshll.u32 %s3865_s13, 4  ;;  %s3764_s26 = int_to_ptr.vmem [resolvable:$false] %s3763_s26 }
  0x89   : > { %s3765_s21 = scalar_lea.vmem %s3764_s26, 8192  ;;  %p3766_p11 = scmp.lt.s32.totalorder %s4125_s14, %s3764_s26 }
  0x8a   : > { %p3761_p5 = pnand %p3759_p13, %p3719_p8  ;;  %p3767_p1 = scmp.lt.s32.totalorder %s3765_s21, %s3758_s15 }
  0x8c   : > { %p3762_p9 = pneg %p3761_p5  ;;  %p3768_p4 = por %p3767_p1, %p3766_p11 }
  0x8e   : > { %p3769_p6 = pnand %p3768_p4, %p3762_p9 }
  0x90   : > { %3772 = shalt.err (!%p3769_p6)
}
  0x91   : > { %3480 = dma.hbm_to_vmem [thread:$0]  (!%p4082_p7), %s4091_s5, 4096, %s4125_s14, %s417_s30, %s5518_s16, %s5518_s16, %s5517_s19  }
  0x92   : > { %440 = sbr.rel (%p3958_p3) target bundleno = 1333 (0x535), region = 64 }
  0x97   : > { %s4155_s0 = sand.u32 1, %s3845_s18   ;;  %p5519_p8 = scmp.ne.s32.totalorder %s5511_s29, 0 }
  0x98   : > { %s2940_s12 = sshll.u32 %s4155_s0, 8  ;;  %s443_s27 = scalar_lea.sflag [#allocation3], %s4155_s0 }
  0x99   : > { %s4159_s28 = scalar_lea.vmem [#allocation2], %s2940_s12 }
  0x9a   : > { %3816 = dma.done.wait (%p5519_p8), %s443_s27, 4096  }
  0x9b   : > { %3818 = vsyncadd (%p5519_p8), %s443_s27, 4294963200  ;;  %s451_s2 = sand.u32 1, %s3953_s23   ;;  %s4166_s24 = scalar_lea.vmem [#allocation5], %s2940_s12 }
  0x9c   : > { %s452_s5 = scalar_lea.sflag [#allocation6], %s451_s2 }
  0x9d   : > { %3820 = dma.done.wait (%p5519_p8), %s452_s5, 4096  }
  0x9e   : > { %3822 = vsyncadd (%p5519_p8), %s452_s5, 4294963200  ;;  %p5520_p3 = scmp.eq.s32.totalorder %s3953_s23, 0 }
  0xa0   : > { %3824 = dma.done.wait (%p5520_p3), [#allocation6], 512   ;;  %p5521_p7 = pmov %p5520_p3 }
  0xa1   : > { %p5522_p12 = pmov %p5520_p3 }
  0xa2   : > { %3826 = vsyncadd (%p5521_p7), [#allocation6], 4294966784 }
  0xa3   : > { %3828 = dma.done.wait (%p5522_p12), [#allocation9], 1536   ;;  %p5523_p2 = pmov %p5520_p3 }
  0xa5   : > { %3830 = vsyncadd (%p5523_p2), [#allocation9], 4294965760  ;;  %p5524_p10 = pmov %p5523_p2 }
  0xa6   : > { %p5525_p0 = pmov %p5523_p2 }
  0xa7   : > { %3832 = dma.done.wait (%p5524_p10), [#allocation12], 3072  }
  0xa8   : > { %3834 = vsyncadd (%p5525_p0), [#allocation12], 4294964224  ;;  %v3543_v0 = vld [vmem:[#allocation10 + $0x38] sm:$0xff]   ;;  %v3545_v2 = vld [vmem:[#allocation10 + $0x30] sm:$0xff]   ;;  %vm892_vm0 = vcmask 523264   ;;  %v5472_v33 = vmov 0.0  }
  0xa9   : > { %v3544_v1 = vld [vmem:[#allocation8 + $0x18] sm:$0xff]   ;;  %3144 = vmatprep.subr.bf16.mxu0 %v3543_v0  ;;  %v3546_v3 = vld [vmem:[#allocation8 + $0x10] sm:$0xff]   ;;  %v3547_v4 = vld [vmem:[#allocation10 + $0x28] sm:$0xff]   ;;  %vm1206_vm1 = vcmask 1041409   ;;  %vm1208_vm2 = vcmask 1042434   ;;  %vm1210_vm3 = vcmask 1043459  }
  0xaa   : > { %3192 = vmatprep.subr.bf16.mxu1 %v3544_v1  ;;  %3145 = vmatpush3.bf16.msra.mxu0 %v3543_v0  ;;  %v3548_v5 = vld [vmem:[#allocation8 + $0x8] sm:$0xff]   ;;  %v3549_v6 = vld [vmem:[#allocation10 + $0x20] sm:$0xff]   ;;  %v525_v10 = vld [vmem:[%s4159_s28 + $0x10] sm:$0xff]  ;;  %vm3867_vm4 = vmmov 0   ;;  %s2947_s22 = sshll.u32 %s4155_s0, 2  ;;  %s3002_s15 = sshll.u32 %s3953_s23, 6 }
  0xab   : > { %3193 = vmatpush3.bf16.msra.mxu1 %v3544_v1  ;;  %3146 = vmatprep.subr.bf16.mxu0 %v3545_v2  ;;  %v523_v7 = vld [vmem:[%s4159_s28] sm:$0xff]  ;;  %v524_v8 = vld [vmem:[%s4159_s28 + $0x8] sm:$0xff]  ;;  %v1105_v15 = vsel %vm892_vm0, %v525_v10, -inf  ;;  %v526_v16 = vld [vmem:[%s4159_s28 + $0x18] sm:$0xff]  ;;  %s518_s13 = scalar_lea.vmem [#allocation14], %s2947_s22  ;;  %s5404_s27 = scalar_lea.hbm %s5460_s11, %s3002_s15 }
  0xac   : > { %3194 = vmatprep.subr.bf16.mxu1 %v3546_v3  ;;  %v3550_v9 = vld [vmem:[#allocation8] sm:$0xff]   ;;  %v603_v11 = vpack.c.bf16 %v524_v8, %v523_v7  ;;  %v1102_v12 = vsel %vm892_vm0, %v523_v7, -inf  ;;  %v1103_v13 = vsel %vm892_vm0, %v524_v8, -inf  ;;  %v3551_v17 = vld [vmem:[#allocation10 + $0x18] sm:$0xff]   ;;  %v528_v20 = vld [vmem:[%s4159_s28 + $0x28] sm:$0xff]  ;;  %v1107_v21 = vsel %vm892_vm0, %v526_v16, -inf }
  0xad   : > { %v1104_v14 = vmax.f32 %v1102_v12, %v1103_v13  ;;  %v527_v19 = vld [vmem:[%s4159_s28 + $0x20] sm:$0xff]  ;;  %v604_v22 = vpack.c.bf16 %v526_v16, %v525_v10  ;;  %v556_v24 = vld [vmem:[%s4166_s24 + $0x8] sm:$0xff]  ;;  %v3552_v25 = vld [vmem:[#allocation10 + $0x10] sm:$0xff]   ;;  %v1111_v49 = vsel %vm892_vm0, %v528_v20, -inf  ;;  %s2780_s26 = sshll.u32 %s518_s13, 4  ;;  %s2767_s23 = scalar_lea.sflag [#allocation4], %s4155_s0  ;;  %s5406_s26 = int_to_ptr.vmem [resolvable:$true] %s2780_s26 }
  0xae   : > { %3147 = vmatpush3.bf16.msra.mxu0 %v3545_v2  ;;  %3200 = vmatprep.mubr.msk.bf16.mxu1 %vm892_vm0, %v603_v11  ;;  %v555_v23 = vld [vmem:[%s4166_s24] sm:$0xff]  ;;  %v605_v26 = vpack.c.bf16 %v528_v20, %v527_v19  ;;  %v4201_v29 = vld [vmem:[%s4159_s28 + $0x48] sm:$0xff]  ;;  %v1109_v34 = vsel %vm892_vm0, %v527_v19, -inf  ;;  %v4210_v36 = vld [vmem:[%s4159_s28 + $0x50] sm:$0xff]  ;;  %p5574_p5 = scmp.ne.s32.totalorder %s5512_s25, 0  ;;  %s3869_s2 = smov [#allocation14]  }
  0xaf   : > { %3195 = vmatpush3.bf16.msra.mxu1 %v3546_v3  ;;  %3148 = vmatprep.subr.bf16.mxu0 %v3547_v4  ;;  %v1106_v18 = vmax.f32 %v1104_v14, %v1105_v15  ;;  %v619_v27 = vpack.c.bf16 %v556_v24, %v555_v23  ;;  %v4198_v28 = vld [vmem:[%s4159_s28 + $0x40] sm:$0xff]  ;;  %v1124_v32 = vsel %vm892_vm0, %v4201_v29, -inf  ;;  %v4213_v37 = vld [vmem:[%s4159_s28 + $0x58] sm:$0xff]  ;;  %v529_v38 = vld [vmem:[%s4159_s28 + $0x30] sm:$0xff]  ;;  %v1126_v40 = vsel %vm892_vm0, %v4210_v36, -inf  ;;  %s3777_s5 = sshll.u32 %s3869_s2, 4  ;;  %s3778_s5 = int_to_ptr.vmem [resolvable:$false] %s3777_s5 }
  0xb0   : > { %3196 = vmatprep.subr.bf16.mxu1 %v3548_v5  ;;  %v1123_v31 = vsel %vm892_vm0, %v4198_v28, -inf  ;;  %v530_v39 = vld [vmem:[%s4159_s28 + $0x38] sm:$0xff]  ;;  %v1128_v41 = vsel %vm892_vm0, %v4213_v37, -inf  ;;  %v3553_v42 = vld [vmem:[#allocation10 + $0x8] sm:$0xff]   ;;  %v4224_v44 = vld [vmem:[%s4159_s28 + $0x60] sm:$0xff]  ;;  %v607_v59 = vpack.c.bf16 %v4201_v29, %v4198_v28  ;;  %p3780_p1 = scmp.lt.s32.totalorder %s5406_s26, %s3778_s5 }
  0xb1   : > { %v1108_v30 = vmax.f32 %v1106_v18, %v1107_v21  ;;  %3160 = vmatprep.mubr.bf16.mxu0 %v619_v27  ;;  %v1125_v35 = vmax.f32 %v1123_v31, %v1124_v32  ;;  %v1130_v46 = vsel %vm892_vm0, %v4224_v44, -inf  ;;  %v4229_v47 = vld [vmem:[%s4159_s28 + $0x80] sm:$0xff]  ;;  %v4232_v48 = vld [vmem:[%s4159_s28 + $0x88] sm:$0xff]  ;;  %v606_v50 = vpack.c.bf16 %v530_v39, %v529_v38  ;;  %v4239_v54 = vld [vmem:[%s4159_s28 + $0x90] sm:$0xff] }
  0xb2   : > { %3149 = vmatpush3.bf16.msra.mxu0 %v3547_v4  ;;  %v3554_v51 = vld [vmem:[#allocation10] sm:$0xff]   ;;  %v4236_v53 = vld [vmem:[%s4159_s28 + $0x68] sm:$0xff]  ;;  %v1144_v56 = vsel %vm892_vm0, %v4229_v47, -inf  ;;  %v1145_v57 = vsel %vm892_vm0, %v4232_v48, -inf  ;;  %v1147_v58 = vsel %vm892_vm0, %v4239_v54, -inf  ;;  %v4252_v62 = vld [vmem:[%s4159_s28 + $0x98] sm:$0xff]  ;;  %v608_v21 = vpack.c.bf16 %v4213_v37, %v4210_v36 }
  0xb3   : > { %3197 = vmatpush3.bf16.msra.mxu1 %v3548_v5  ;;  %3150 = vmatprep.subr.bf16.mxu0 %v3549_v6  ;;  %v1127_v43 = vmax.f32 %v1125_v35, %v1126_v40  ;;  %v1110_v45 = vmax.f32 %v1108_v30, %v1109_v34  ;;  %v1132_v55 = vsel %vm892_vm0, %v4236_v53, -inf  ;;  %v1146_v61 = vmax.f32 %v1144_v56, %v1145_v57  ;;  %v3555_v63 = vld [vmem:[#allocation7 + $0x18] sm:$0xff]   ;;  %v557_v1 = vld [vmem:[%s4166_s24 + $0x10] sm:$0xff]  ;;  %v4258_v3 = vld [vmem:[%s4159_s28 + $0xa0] sm:$0xff] }
  0xb4   : > { %3198 = vmatprep.subr.bf16.mxu1 %v3550_v9  ;;  %v1149_v2 = vsel %vm892_vm0, %v4252_v62, -inf  ;;  %v1113_v4 = vsel %vm892_vm0, %v529_v38, -inf  ;;  %v558_v5 = vld [vmem:[%s4166_s24 + $0x18] sm:$0xff]  ;;  %v4263_v7 = vld [vmem:[%s4159_s28 + $0x70] sm:$0xff]  ;;  %v559_v10 = vld [vmem:[%s4166_s24 + $0x20] sm:$0xff]  ;;  %v1151_v13 = vsel %vm892_vm0, %v4258_v3, -inf  ;;  %v609_v36 = vpack.c.bf16 %v4236_v53, %v4224_v44 }
  0xb5   : > { %v1129_v52 = vmax.f32 %v1127_v43, %v1128_v41  ;;  %v1112_v0 = vmax.f32 %v1110_v45, %v1111_v49  ;;  %v1148_v8 = vmax.f32 %v1146_v61, %v1147_v58  ;;  %v560_v11 = vld [vmem:[%s4166_s24 + $0x28] sm:$0xff]  ;;  %v1134_v12 = vsel %vm892_vm0, %v4263_v7, -inf  ;;  %v4278_v16 = vld [vmem:[%s4159_s28 + $0xb0] sm:$0xff]  ;;  %v4313_v38 = vld [vmem:[%s4159_s28 + $0xb8] sm:$0xff] }
  0xb6   : > { %3151 = vmatpush3.bf16.msra.mxu0 %v3549_v6  ;;  %v1115_v14 = vsel %vm892_vm0, %v530_v39, -inf  ;;  %v4284_v18 = vld [vmem:[%s4159_s28 + $0xc8] sm:$0xff]  ;;  %v620_v20 = vpack.c.bf16 %v558_v5, %v557_v1  ;;  %v4294_v24 = vld [vmem:[%s4159_s28 + $0xd0] sm:$0xff]  ;;  %v1155_v32 = vsel %vm892_vm0, %v4278_v16, -inf  ;;  %v4316_v40 = vld [vmem:[%s4159_s28 + $0xe0] sm:$0xff]  ;;  %v1157_v43 = vsel %vm892_vm0, %v4313_v38, -inf }
  0xb7   : > { %3199 = vmatpush3.bf16.msra.mxu1 %v3550_v9  ;;  %3152 = vmatprep.subr.bf16.mxu0 %v3551_v17  ;;  %v1131_v60 = vmax.f32 %v1129_v52, %v1130_v46  ;;  %v4266_v9 = vld [vmem:[%s4159_s28 + $0xa8] sm:$0xff]  ;;  %v1150_v15 = vmax.f32 %v1148_v8, %v1149_v2  ;;  %v1114_v19 = vmax.f32 %v1112_v0, %v1113_v4  ;;  %v3556_v30 = vld [vmem:[#allocation7 + $0x10] sm:$0xff]   ;;  %v1166_v34 = vsel %vm892_vm0, %v4284_v18, -inf  ;;  %v562_v52 = vld [vmem:[%s4166_s24 + $0x38] sm:$0xff] }
  0xb8   : > { %3232 = vmatprep.subr.bf16.mxu1 %v5472_v33  ;;  %v1153_v23 = vsel %vm892_vm0, %v4266_v9, -inf  ;;  %v1168_v35 = vsel %vm892_vm0, %v4294_v24, -inf  ;;  %v4325_v45 = vld [vmem:[%s4159_s28 + $0xe8] sm:$0xff]  ;;  %v1172_v53 = vsel %vm892_vm0, %v4316_v40, -inf  ;;  %v563_v56 = vld [vmem:[%s4166_s24 + $0x40] sm:$0xff]  ;;  %v4341_v0 = vld [vmem:[%s4159_s28 + $0xf8] sm:$0xff] }
  0xb9   : > { %v1133_v6 = vmax.f32 %v1131_v60, %v1132_v55  ;;  %v1152_v28 = vmax.f32 %v1150_v15, %v1151_v13  ;;  %v1116_v41 = vmax.f32 %v1114_v19, %v1115_v14  ;;  %v4333_v55 = vld [vmem:[%s4159_s28 + $0xf0] sm:$0xff]  ;;  %v564_v57 = vld [vmem:[%s4166_s24 + $0x48] sm:$0xff]  ;;  %v3558_v60 = vld [vmem:[#allocation7] sm:$0xff]   ;;  %v1178_v13 = vsel %vm892_vm0, %v4341_v0, -inf }
  0xba   : > { %3201 = vmatmul.mubr.msk.bf16.vlgmr.msra.gmra.mxu1 %vm892_vm0, %v604_v22  ;;  %3153 = vmatpush3.bf16.msra.mxu0 %v3551_v17  ;;  %v4281_v17 = vld [vmem:[%s4159_s28 + $0xc0] sm:$0xff]  ;;  %v4289_v22 = vld [vmem:[%s4159_s28 + $0x78] sm:$0xff]  ;;  %v1176_v5 = vsel %vm892_vm0, %v4333_v55, -inf  ;;  %v623_v8 = vpack.c.bf16 %v564_v57, %v563_v56  ;;  %v565_v14 = vld [vmem:[%s4166_s24 + $0x50] sm:$0xff] }
  0xbb   : > { %3154 = vmatprep.subr.bf16.mxu0 %v3552_v25  ;;  %3204 = vmatprep.mubr.msk.bf16.mxu1 %vm892_vm0, %v605_v26  ;;  %v621_v26 = vpack.c.bf16 %v560_v11, %v559_v10  ;;  %v1135_v27 = vmax.f32 %v1133_v6, %v1134_v12  ;;  %v1165_v29 = vsel %vm892_vm0, %v4281_v17, -inf  ;;  %v1136_v31 = vsel %vm892_vm0, %v4289_v22, -inf  ;;  %v573_v56 = vld [vmem:[%s4166_s24 + $0x90] sm:$0xff]  ;;  %v574_v57 = vld [vmem:[%s4166_s24 + $0x98] sm:$0xff] }
  0xbc   : > { %3233 = vmatpush3.bf16.msra.mxu1 %v3555_v63  ;;  %v1154_v37 = vmax.f32 %v1152_v28, %v1153_v23  ;;  %v1167_v39 = vmax.f32 %v1165_v29, %v1166_v34  ;;  %v1117_v61 = vrot.slane %v1116_v41, 4  ;;  %v1174_v63 = vsel %vm892_vm0, %v4325_v45, -inf }
  0xbd   : > { %3234 = vmatprep.subr.bf16.mxu1 %v5472_v33  ;;  %v1137_v46 = vmax.f32 %v1135_v27, %v1136_v31  ;;  %v610_v6 = vpack.c.bf16 %v4289_v22, %v4263_v7  ;;  %v611_v10 = vpack.c.bf16 %v4232_v48, %v4229_v47  ;;  %v567_v47 = vld [vmem:[%s4166_s24 + $0x60] sm:$0xff]  ;;  %v568_v48 = vld [vmem:[%s4166_s24 + $0x68] sm:$0xff]  ;;  %v612_v29 = vpack.c.bf16 %v4252_v62, %v4239_v54 }
  0xbe   : > { %3155 = vmatpush3.bf16.msra.mxu0 %v3552_v25  ;;  %v4297_v25 = vld [vmem:[%s4159_s28 + $0xd8] sm:$0xff]  ;;  %v1156_v49 = vmax.f32 %v1154_v37, %v1155_v32  ;;  %v1118_v15 = vmax.f32 %v1116_v41, %v1117_v61  ;;  %v613_v31 = vpack.c.bf16 %v4266_v9, %v4258_v3  ;;  %v569_v37 = vld [vmem:[%s4166_s24 + $0x70] sm:$0xff]  ;;  %v571_v41 = vld [vmem:[%s4166_s24 + $0x80] sm:$0xff]  ;;  %s3773_s28 = scalar_lea.vmem %s5406_s26, 64 }
  0xbf   : > { %3156 = vmatprep.subr.bf16.mxu0 %v3553_v42  ;;  %v1170_v44 = vsel %vm892_vm0, %v4297_v25, -inf  ;;  %v1138_v2 = vrot.slane %v1137_v46, 4  ;;  %v616_v61 = vpack.c.bf16 %v4297_v25, %v4294_v24  ;;  %v579_v25 = vld [vmem:[%s4166_s24 + $0xc0] sm:$0xff]  ;;  %p3774_p13 = scmp.ne.s32.totalorder %s5406_s26, %s3773_s28 }
  0xc0   : > { %3235 = vmatpush3.bf16.msra.mxu1 %v3556_v30  ;;  %v1158_v58 = vmax.f32 %v1156_v49, %v1157_v43  ;;  %v1119_v23 = vrot.slane %v1118_v15, 2  ;;  %v625_v30 = vpack.c.bf16 %v568_v48, %v567_v47  ;;  %v615_v49 = vpack.c.bf16 %v4284_v18, %v4281_v17 }
  0xc1   : > { %3236 = vmatprep.subr.bf16.mxu1 %v5472_v33  ;;  %v1139_v19 = vmax.f32 %v1137_v46, %v1138_v2  ;;  %v628_v18 = vpack.c.bf16 %v574_v57, %v573_v56  ;;  %p3775_p9 = pnand %p3774_p13, %p5574_p5 }
  0xc2   : > { %3205 = vmatmul.mubr.msk.bf16.gmra.mxu1 %vm892_vm0, %v606_v50  ;;  %3157 = vmatpush3.bf16.msra.mxu0 %v3553_v42  ;;  %v561_v42 = vld [vmem:[%s4166_s24 + $0x30] sm:$0xff]  ;;  %v1169_v50 = vmax.f32 %v1167_v39, %v1168_v35  ;;  %v1159_v11 = vrot.slane %v1158_v58, 4  ;;  %v1120_v35 = vmax.f32 %v1118_v15, %v1119_v23  ;;  %v570_v39 = vld [vmem:[%s4166_s24 + $0x78] sm:$0xff] }
  0xc3   : > { %3158 = vmatprep.subr.bf16.mxu0 %v3554_v51  ;;  %3208 = vmatprep.mubr.msk.bf16.mxu1 %vm892_vm0, %v607_v59  ;;  %v622_v1 = vpack.c.bf16 %v562_v52, %v561_v42  ;;  %v572_v42 = vld [vmem:[%s4166_s24 + $0x88] sm:$0xff]  ;;  %v626_v9 = vpack.c.bf16 %v570_v39, %v569_v37  ;;  %v585_v23 = vld [vmem:[%s4166_s24 + $0xf0] sm:$0xff]  ;;  %v4456_v37 = vld [vmem:[#allocation13 + $0x38] sm:$0xff]  ;;  %p3776_p11 = pneg %p3775_p9 }
  0xc4   : > { %v1171_v59 = vmax.f32 %v1169_v50, %v1170_v44  ;;  %v1160_v22 = vmax.f32 %v1158_v58, %v1159_v11  ;;  %v1121_v43 = vrot.slane %v1120_v35, 1  ;;  %v614_v44 = vpack.c.bf16 %v4313_v38, %v4278_v16  ;;  %v575_v58 = vld [vmem:[%s4166_s24 + $0xa0] sm:$0xff]  ;;  %v580_v11 = vld [vmem:[%s4166_s24 + $0xc8] sm:$0xff]  ;;  %v4461_v39 = vld [vmem:[#allocation13 + $0x30] sm:$0xff] }
  0xc5   : > { %v627_v46 = vpack.c.bf16 %v572_v42, %v571_v41  ;;  %v4465_v41 = vld [vmem:[#allocation13 + $0x28] sm:$0xff]  ;;  %v4469_v42 = vld [vmem:[#allocation13 + $0x20] sm:$0xff] }
  0xc6   : > { %3159 = vmatpush3.bf16.msra.mxu0 %v3554_v51  ;;  %v3557_v51 = vld [vmem:[#allocation7 + $0x8] sm:$0xff]   ;;  %v1173_v4 = vmax.f32 %v1171_v59, %v1172_v53  ;;  %v1161_v34 = vrot.slane %v1160_v22, 2  ;;  %v1122_v52 = vmax.f32 %v1120_v35, %v1121_v43 }
  0xc7   : > { %3244 = vmatprep.subr.mxu0 %v5472_v33  ;;  %3237 = vmatpush3.bf16.msra.mxu1 %v3557_v51  ;;  %v576_v59 = vld [vmem:[%s4166_s24 + $0xa8] sm:$0xff] }
  0xc8   : > { %3238 = vmatprep.subr.bf16.mxu1 %v5472_v33  ;;  %v1175_v12 = vmax.f32 %v1173_v4, %v1174_v63  ;;  %v1162_v62 = vmax.f32 %v1160_v22, %v1161_v34  ;;  %v1186_v38 = vpack.c.bf16 %v1122_v52, %v1122_v52  ;;  %v629_v63 = vpack.c.bf16 %v576_v59, %v575_v58  ;;  %v4434_v34 = vld [vmem:[#allocation13 + $0x50] sm:$0xff]  ;;  %v4439_v35 = vld [vmem:[#allocation13 + $0x48] sm:$0xff] }
  0xc9   : > { %3161 = vmatmul.mubr.bf16.vlgmr.msra.gmra.mxu0 %v620_v20  ;;  %v566_v20 = vld [vmem:[%s4166_s24 + $0x58] sm:$0xff]  ;;  %v4487_v43 = vld [vmem:[#allocation13 + $0x8] sm:$0xff] }
  0xca   : > { %3209 = vmatmul.mubr.msk.bf16.gmra.mxu1 %vm892_vm0, %v608_v21  ;;  %3164 = vmatprep.mubr.bf16.mxu0 %v621_v26  ;;  %v1177_v7 = vmax.f32 %v1175_v12, %v1176_v5  ;;  %v1140_v26 = vrot.slane %v1139_v19, 2  ;;  %v624_v27 = vpack.c.bf16 %v566_v20, %v565_v14  ;;  %v1163_v51 = vrot.slane %v1162_v62, 1  ;;  %v581_v20 = vld [vmem:[%s4166_s24 + $0xd0] sm:$0xff] }
  0xcb   : > { %3212 = vmatprep.mubr.msk.bf16.mxu1 %vm892_vm0, %v609_v36  ;;  %3239 = vmatpush3.bf16.msra.mxu1 %v3558_v60  ;;  %v1202_v5 = vunpack.c.l.b16 %v1186_v38  ;;  %v631_v14 = vpack.c.bf16 %v580_v11, %v579_v25 }
  0xcc   : > { %3279 = vmatprep.subr.mxu1 %v5472_v33  ;;  %v1179_v21 = vmax.f32 %v1177_v7, %v1178_v13  ;;  %v1141_v36 = vmax.f32 %v1139_v19, %v1140_v26  ;;  %v1164_v16 = vmax.f32 %v1162_v62, %v1163_v51  ;;  %v618_v13 = vpack.c.bf16 %v4341_v0, %v4333_v55  ;;  %v582_v7 = vld [vmem:[%s4166_s24 + $0xd8] sm:$0xff]  ;;  %v583_v55 = vld [vmem:[%s4166_s24 + $0xe0] sm:$0xff]  ;;  %v584_v0 = vld [vmem:[%s4166_s24 + $0xe8] sm:$0xff] }
  0xcd   : > { %v632_v48 = vpack.c.bf16 %v582_v7, %v581_v20  ;;  %v633_v22 = vpack.c.bf16 %v584_v0, %v583_v55  ;;  %v586_v26 = vld [vmem:[%s4166_s24 + $0xf8] sm:$0xff]  ;;  %v4481_v62 = vld [vmem:[#allocation13 + $0x10] sm:$0xff] }
  0xce   : > { %v1180_v28 = vrot.slane %v1179_v21, 4  ;;  %v1142_v3 = vrot.slane %v1141_v36, 1  ;;  %v1188_v4 = vpack.c.bf16 %v1164_v16, %v1164_v16 }
  0xd0   : > { %v1181_v32 = vmax.f32 %v1179_v21, %v1180_v28  ;;  %v1143_v53 = vmax.f32 %v1141_v36, %v1142_v3  ;;  %v1204_v12 = vunpack.c.l.b16 %v1188_v4  ;;  %v4408_v28 = vld [vmem:[#allocation13 + $0x78] sm:$0xff]  ;;  %v4445_v36 = vld [vmem:[#allocation13 + $0x40] sm:$0xff] }
  0xd1   : > { %3165 = vmatmul.mubr.bf16.gmra.mxu0 %v622_v1  ;;  %v617_v1 = vpack.c.bf16 %v4325_v45, %v4316_v40  ;;  %v4493_v3 = vld [vmem:[#allocation13] sm:$0xff] }
  0xd2   : > { %3213 = vmatmul.mubr.msk.bf16.gmra.mxu1 %vm892_vm0, %v610_v6  ;;  %3168 = vmatprep.mubr.bf16.mxu0 %v623_v8  ;;  %v1182_v54 = vrot.slane %v1181_v32, 2  ;;  %v1187_v17 = vpack.c.bf16 %v1143_v53, %v1143_v53  ;;  %v577_v8 = vld [vmem:[%s4166_s24 + $0xb0] sm:$0xff]  ;;  %5526 = vst [vmem:[#allocation25_spill] sm:$0xff] %v4493_v3 }
  0xd3   : > { %3216 = vmatprep.mubr.msk.bf16.mxu1 %vm892_vm0, %v611_v10  ;;  %v578_v10 = vld [vmem:[%s4166_s24 + $0xb8] sm:$0xff]  ;;  %3245 = vmatpush3.msra.mxu0 %v4408_v28  ;;  %s3779_s24 = scalar_lea.vmem %s3778_s5, 128 }
  0xd4   : > { %v1183_v50 = vmax.f32 %v1181_v32, %v1182_v54  ;;  %v1203_v6 = vunpack.c.l.b16 %v1187_v17  ;;  %v630_v45 = vpack.c.bf16 %v578_v10, %v577_v8  ;;  %3246 = vmatprep.subr.mxu0 %v5472_v33  ;;  %v4432_v32 = vld [vmem:[#allocation13 + $0x58] sm:$0xff]  ;;  %p3781_p4 = scmp.lt.s32.totalorder %s3779_s24, %s3773_s28 }
  0xd5   : > { %v4475_v54 = vld [vmem:[#allocation13 + $0x18] sm:$0xff] }
  0xd6   : > { %v1184_v60 = vrot.slane %v1183_v50, 1  ;;  %v1207_v40 = vsel %vm1206_vm1, %v1203_v6, %v1202_v5  ;;  %p3782_p6 = por %p3781_p4, %p3780_p1 }
  0xd7   : > { %v1209_v19 = vsel %vm1208_vm2, %v1204_v12, %v1207_v40 }
  0xd8   : > { %v1185_v2 = vmax.f32 %v1183_v50, %v1184_v60  ;;  %p3783_p8 = pnand %p3782_p6, %p3776_p11 }
  0xd9   : > { %3169 = vmatmul.mubr.bf16.gmra.mxu0 %v624_v27  ;;  %v634_v27 = vpack.c.bf16 %v586_v26, %v585_v23 }
  0xda   : > { %3217 = vmatmul.mubr.msk.bf16.gmra.mxu1 %vm892_vm0, %v612_v29  ;;  %3172 = vmatprep.mubr.bf16.mxu0 %v625_v30  ;;  %v1189_v24 = vpack.c.bf16 %v1185_v2, %v1185_v2  ;;  %v4410_v29 = vld [vmem:[#allocation13 + $0x70] sm:$0xff]  ;;  %v4415_v30 = vld [vmem:[#allocation13 + $0x68] sm:$0xff] }
  0xdb   : > { %3220 = vmatprep.mubr.msk.bf16.mxu1 %vm892_vm0, %v613_v31  ;;  %3247 = vmatpush3.msra.mxu0 %v4410_v29  ;;  %v4421_v31 = vld [vmem:[#allocation13 + $0x60] sm:$0xff] }
  0xdc   : > { %v1205_v15 = vunpack.c.l.b16 %v1189_v24  ;;  %3248 = vmatprep.subr.mxu0 %v5472_v33 }
  0xdd   : > { %3249 = vmatpush3.msra.mxu0 %v4415_v30 }
  0xde   : > { %v1211_v47 = vsel %vm1210_vm3, %v1205_v15, %v1209_v19  ;;  %3250 = vmatprep.subr.mxu0 %v5472_v33 }
  0xdf   : > { %v1212_v21 = vpack.c.b16 %v1211_v47, %v1211_v47  ;;  %3251 = vmatpush3.msra.mxu0 %v4421_v31 }
  0xe0   : > { %3252 = vmatprep.subr.mxu0 %v5472_v33 }
  0xe1   : > { %3173 = vmatmul.mubr.bf16.gmra.mxu0 %v626_v9 }
  0xe2   : > { %3221 = vmatmul.mubr.msk.bf16.gmra.mxu1 %vm892_vm0, %v614_v44  ;;  %3176 = vmatprep.mubr.bf16.mxu0 %v627_v46 }
  0xe3   : > { %3224 = vmatprep.mubr.msk.bf16.mxu1 %vm892_vm0, %v615_v49  ;;  %3253 = vmatpush3.msra.mxu0 %v4432_v32 }
  0xe4   : > { %3254 = vmatprep.subr.mxu0 %v5472_v33 }
  0xe5   : > { %3255 = vmatpush3.msra.mxu0 %v4434_v34 }
  0xe6   : > { %3256 = vmatprep.subr.mxu0 %v5472_v33 }
  0xe7   : > { %3257 = vmatpush3.msra.mxu0 %v4439_v35 }
  0xe8   : > { %3258 = vmatprep.subr.mxu0 %v5472_v33 }
  0xe9   : > { %3177 = vmatmul.mubr.bf16.gmra.mxu0 %v628_v18 }
  0xea   : > { %3225 = vmatmul.mubr.msk.bf16.gmra.mxu1 %vm892_vm0, %v616_v61  ;;  %3180 = vmatprep.mubr.bf16.mxu0 %v629_v63 }
  0xeb   : > { %3228 = vmatprep.mubr.msk.bf16.mxu1 %vm892_vm0, %v617_v1  ;;  %3259 = vmatpush3.msra.mxu0 %v4445_v36 }
  0xec   : > { %3260 = vmatprep.subr.mxu0 %v5472_v33 }
  0xed   : > { %3261 = vmatpush3.msra.mxu0 %v4456_v37 }
  0xee   : > { %3262 = vmatprep.subr.mxu0 %v5472_v33 }
  0xef   : > { %3263 = vmatpush3.msra.mxu0 %v4461_v39 }
  0xf0   : > { %3264 = vmatprep.subr.mxu0 %v5472_v33 }
  0xf1   : > { %3181 = vmatmul.mubr.bf16.gmra.mxu0 %v630_v45 }
  0xf2   : > { %3229 = vmatmul.mubr.msk.bf16.gmra.mxu1 %vm892_vm0, %v618_v13  ;;  %3184 = vmatprep.mubr.bf16.mxu0 %v631_v14 }
  0xf3   : > { %3240 = vmatprep.mubr.msk.bf16.mxu1 %vm3867_vm4, %v5472_v33  ;;  %3265 = vmatpush3.msra.mxu0 %v4465_v41 }
  0xf4   : > { %3266 = vmatprep.subr.mxu0 %v5472_v33 }
  0xf5   : > { %3267 = vmatpush3.msra.mxu0 %v4469_v42 }
  0xf6   : > { %3268 = vmatprep.subr.mxu0 %v5472_v33 }
  0xf7   : > { %3269 = vmatpush3.msra.mxu0 %v4475_v54 }
  0xf8   : > { %3270 = vmatprep.subr.mxu0 %v5472_v33 }
  0xf9   : > { %3185 = vmatmul.mubr.bf16.gmra.mxu0 %v632_v48 }
  0xfa   : > { %3241 = vmatmul.mubr.msk.bf16.vlgmr.msra.gmra.mxu1 %vm892_vm0, %v1212_v21  ;;  %3188 = vmatprep.mubr.bf16.mxu0 %v633_v22 }
  0xfb   : > { %3311 = vmatprep.mubr.msk.f32.mxu1 %vm3867_vm4, %v5472_v33  ;;  %3280 = vmatpush3.msra.mxu1 %v4408_v28 }
  0xfc   : > { %3281 = vmatprep.subr.mxu1 %v5472_v33  ;;  %3271 = vmatpush3.msra.mxu0 %v4481_v62 }
  0xfd   : > { %3282 = vmatpush3.msra.mxu1 %v4410_v29  ;;  %3272 = vmatprep.subr.mxu0 %v5472_v33 }
  0xfe   : > { %3283 = vmatprep.subr.mxu1 %v5472_v33  ;;  %3273 = vmatpush3.msra.mxu0 %v4487_v43 }
  0xff   : > { %3284 = vmatpush3.msra.mxu1 %v4415_v30  ;;  %3274 = vmatprep.subr.mxu0 %v5472_v33 }
 0x100   : > { %3285 = vmatprep.subr.mxu1 %v5472_v33  ;;  %3275 = vmatpush3.msra.mxu0 %v4493_v3 }
 0x101   : > { %3189 = vmatmul.mubr.bf16.gmra.mxu0 %v634_v27  ;;  %3286 = vmatpush3.msra.mxu1 %v4421_v31 }
 0x102   : > { %3276 = vmatprep.mubr.msk.f32.mxu0 %vm3867_vm4, %v5472_v33  ;;  %3287 = vmatprep.subr.mxu1 %v5472_v33 }
 0x103   : > { %3288 = vmatpush3.msra.mxu1 %v4432_v32 }
 0x104   : > { %3289 = vmatprep.subr.mxu1 %v5472_v33 }
 0x105   : > { %3290 = vmatpush3.msra.mxu1 %v4434_v34 }
 0x106   : > { %3291 = vmatprep.subr.mxu1 %v5472_v33 }
 0x107   : > { %3292 = vmatpush3.msra.mxu1 %v4439_v35 }
 0x108   : > { %3293 = vmatprep.subr.mxu1 %v5472_v33 }
 0x109   : > { %3294 = vmatpush3.msra.mxu1 %v4445_v36 }
 0x10a   : > { %3295 = vmatprep.subr.mxu1 %v5472_v33 }
 0x10b   : > { %3296 = vmatpush3.msra.mxu1 %v4456_v37 }
 0x10c   : > { %3297 = vmatprep.subr.mxu1 %v5472_v33 }
 0x10d   : > { %3298 = vmatpush3.msra.mxu1 %v4461_v39 }
 0x10e   : > { %3299 = vmatprep.subr.mxu1 %v5472_v33 }
 0x10f   : > { %3300 = vmatpush3.msra.mxu1 %v4465_v41 }
 0x110   : > { %3301 = vmatprep.subr.mxu1 %v5472_v33 }
 0x111   : > { %3302 = vmatpush3.msra.mxu1 %v4469_v42 }
 0x112   : > { %3303 = vmatprep.subr.mxu1 %v5472_v33 }
 0x113   : > { %3304 = vmatpush3.msra.mxu1 %v4475_v54 }
 0x114   : > { %3305 = vmatprep.subr.mxu1 %v5472_v33 }
 0x115   : > { %3306 = vmatpush3.msra.mxu1 %v4481_v62 }
 0x116   : > { %3307 = vmatprep.subr.mxu1 %v5472_v33 }
 0x117   : > { %3308 = vmatpush3.msra.mxu1 %v4487_v43 }
 0x118   : > { %3309 = vmatprep.subr.mxu1 %v5472_v33 }
 0x119   : > { %3310 = vmatpush3.msra.mxu1 %v4493_v3 }
 0x11a   : > { %3362 = vmatprep.subr.mxu1 %v5472_v33 }
 0x17a   : > { %v3202_v9 = vpop.f32.mrf.mxu1 }
 0x17c   : > { %v975_v44 = vpop.f32.mrf.mxu1 }
 0x17e   : > { %v3203_v46 = vpop.f32.mrf.mxu1 }
 0x180   : > { %v978_v49 = vpop.f32.mrf.mxu1 }
 0x182   : > { %v4503_v50 = vpop.f32.mrf.mxu1 }
 0x184   : > { %v991_v51 = vpop.f32.mrf.mxu1 }
 0x186   : > { %v4505_v52 = vpop.f32.mrf.mxu1 }
 0x188   : > { %v4507_v53 = vpop.f32.mrf.mxu1 }
 0x189   : > { %v3162_v56 = vpop.f32.mrf.mxu0 }
 0x18a   : > { %v3210_v57 = vpop.f32.mrf.mxu1  ;;  %v4541_v26 = vadd.f32 %v3202_v9, %v3162_v56 }
 0x18b   : > { %v741_v58 = vpop.f32.mrf.mxu0 }
 0x18c   : > { %v1007_v59 = vpop.f32.mrf.mxu1  ;;  %v4529_v7 = vadd.f32 %v975_v44, %v741_v58  ;;  %5531 = vst [vmem:[#allocation30_spill] sm:$0xff] %v4541_v26 }
 0x18d   : > { %v3163_v60 = vpop.f32.mrf.mxu0 }
 0x18e   : > { %v3211_v16 = vpop.f32.mrf.mxu1  ;;  %5530 = vst [vmem:[#allocation29_spill] sm:$0xff] %v4529_v7 }
 0x18f   : > { %v744_v38 = vpop.f32.mrf.mxu0 }
 0x190   : > { %v1010_v17 = vpop.f32.mrf.mxu1  ;;  %v4521_v14 = vadd.f32 %v978_v49, %v744_v38 }
 0x191   : > { %v4509_v18 = vpop.f32.mrf.mxu0 }
 0x192   : > { %v4511_v61 = vpop.f32.mrf.mxu1  ;;  %5528 = vst [vmem:[#allocation27_spill] sm:$0xff] %v4521_v14  ;;  %v1282_v48 = vadd.f32 %v4521_v14, %v4529_v7  ;;  %v1335_v27 = vmul.f32 %v4521_v14, %v4521_v14 }
 0x193   : > { %v757_v63 = vpop.f32.mrf.mxu0 }
 0x194   : > { %v1023_v1 = vpop.f32.mrf.mxu1 }
 0x195   : > { %v4513_v2 = vpop.f32.mrf.mxu0 }
 0x196   : > { %v4515_v4 = vpop.f32.mrf.mxu1 }
 0x197   : > { %v4517_v5 = vpop.f32.mrf.mxu0 }
 0x198   : > { %v1026_v6 = vpop.f32.mrf.mxu1 }
 0x199   : > { %v3170_v8 = vpop.f32.mrf.mxu0 }
 0x19a   : > { %v3218_v10 = vpop.f32.mrf.mxu1  ;;  %v4535_v21 = vadd.f32 %v3210_v57, %v3170_v8  ;;  %v1283_v57 = vadd.f32 %v1282_v48, %v4541_v26  ;;  %v4557_v8 = vadd.f32 %v3203_v46, %v3163_v60  ;;  %v4569_v46 = vadd.f32 %v991_v51, %v757_v63 }
 0x19b   : > { %v773_v24 = vpop.f32.mrf.mxu0 }
 0x19c   : > { %v1039_v25 = vpop.f32.mrf.mxu1  ;;  %v4523_v15 = vadd.f32 %v1007_v59, %v773_v24  ;;  %v1334_v59 = vmul.f32 %v4529_v7, %v4529_v7 }
 0x19d   : > { %v3171_v11 = vpop.f32.mrf.mxu0 }
 0x19e   : > { %v3219_v12 = vpop.f32.mrf.mxu1  ;;  %5529 = vst [vmem:[#allocation28_spill] sm:$0xff] %v4523_v15  ;;  %v4551_v38 = vadd.f32 %v3211_v16, %v3171_v11  ;;  %v1366_v24 = vadd.f32 %v1335_v27, %v1334_v59  ;;  %v1336_v16 = vmul.f32 %v4541_v26, %v4541_v26  ;;  %v1284_v11 = vadd.f32 %v1283_v57, %v4557_v8 }
 0x19f   : > { %v776_v40 = vpop.f32.mrf.mxu0 }
 0x1a0   : > { %v4519_v45 = vadd.f32 %v1010_v17, %v776_v40  ;;  %v1042_v13 = vpop.f32.mrf.mxu1  ;;  %v1342_v40 = vmul.f32 %v4523_v15, %v4523_v15  ;;  %v1367_v59 = vadd.f32 %v1366_v24, %v1336_v16  ;;  %v1285_v51 = vadd.f32 %v1284_v11, %v4569_v46 }
 0x1a1   : > { %v4525_v19 = vpop.f32.mrf.mxu0 }
 0x1a2   : > { %5527 = vst [vmem:[#allocation26_spill] sm:$0xff] %v4519_v45  ;;  %v4527_v20 = vpop.f32.mrf.mxu1  ;;  %v1295_v47 = vadd.f32 %v4519_v45, %v4523_v15  ;;  %v1343_v17 = vmul.f32 %v4519_v45, %v4519_v45 }
 0x1a3   : > { %v789_v55 = vpop.f32.mrf.mxu0 }
 0x1a4   : > { %v1055_v0 = vpop.f32.mrf.mxu1  ;;  %v1296_v44 = vadd.f32 %v1295_v47, %v4535_v21  ;;  %v1379_v48 = vadd.f32 %v1343_v17, %v1342_v40  ;;  %v4567_v45 = vadd.f32 %v1023_v1, %v789_v55 }
 0x1a5   : > { %v4537_v22 = vpop.f32.mrf.mxu0 }
 0x1a6   : > { %v4539_v23 = vpop.f32.mrf.mxu1  ;;  %v1297_v47 = vadd.f32 %v1296_v44, %v4551_v38  ;;  %v1344_v44 = vmul.f32 %v4535_v21, %v4535_v21 }
 0x1a7   : > { %v792_v49 = vpop.f32.mrf.mxu0 }
 0x1a8   : > { %v4546_v58 = vpop.f32.mrf.mxu1  ;;  %v1298_v15 = vadd.f32 %v1297_v47, %v4567_v45  ;;  %v4578_v3 = vadd.f32 %v1026_v6, %v792_v49  ;;  %v1380_v63 = vadd.f32 %v1379_v48, %v1344_v44  ;;  %v4601_v49 = vadd.f32 %v4507_v53, %v4517_v5 }
 0x1a9   : > { %v3178_v9 = vpop.f32.mrf.mxu0  ;;  %v1338_v53 = vmul.f32 %v4569_v46, %v4569_v46  ;;  %v4617_v5 = vadd.f32 %v4511_v61, %v4525_v19  ;;  %v4621_v44 = vadd.f32 %v4503_v50, %v4509_v18  ;;  %v1346_v61 = vmul.f32 %v4567_v45, %v4567_v45 }
 0x1aa   : > { %v4555_v56 = vpop.f32.mrf.mxu1  ;;  %v4580_v57 = vadd.f32 %v3218_v10, %v3178_v9  ;;  %v1345_v9 = vmul.f32 %v4551_v38, %v4551_v38  ;;  %v1299_v40 = vadd.f32 %v1298_v15, %v4578_v3 }
 0x1ab   : > { %v805_v33 = vpop.f32.mrf.mxu0 }
 0x1ac   : > { %v4562_v14 = vpop.f32.mrf.mxu1  ;;  %v4571_v60 = vadd.f32 %v1039_v25, %v805_v33  ;;  %5532 = vst [vmem:[#allocation31_spill] sm:$0xff] %v4580_v57  ;;  %v1337_v33 = vmul.f32 %v4557_v8, %v4557_v8  ;;  %v1300_v19 = vadd.f32 %v1299_v40, %v4617_v5  ;;  %v1347_v40 = vmul.f32 %v4578_v3, %v4578_v3 }
 0x1ad   : > { %v3179_v7 = vpop.f32.mrf.mxu0 }
 0x1ae   : > { %v4573_v27 = vpop.f32.mrf.mxu1  ;;  %v1350_v17 = vmul.f32 %v4571_v60, %v4571_v60  ;;  %v4591_v24 = vadd.f32 %v3219_v12, %v3179_v7  ;;  %v1352_v7 = vmul.f32 %v4580_v57, %v4580_v57 }
 0x1af   : > { %v808_v26 = vpop.f32.mrf.mxu0 }
 0x1b0   : > { %v4582_v1 = vadd.f32 %v1042_v13, %v808_v26  ;;  %v4584_v55 = vpop.f32.mrf.mxu1  ;;  %5534 = vst [vmem:[#allocation33_spill] sm:$0xff] %v4591_v24  ;;  %v1368_v26 = vadd.f32 %v1367_v59, %v1337_v33  ;;  %v1381_v59 = vadd.f32 %v1380_v63, %v1345_v9  ;;  %v1353_v33 = vmul.f32 %v4591_v24, %v4591_v24 }
 0x1b1   : > { %v3182_v25 = vpop.f32.mrf.mxu0 }
 0x1b2   : > { %5533 = vst [vmem:[#allocation32_spill] sm:$0xff] %v4582_v1  ;;  %v1308_v6 = vadd.f32 %v4582_v1, %v4571_v60  ;;  %v1351_v10 = vmul.f32 %v4582_v1, %v4582_v1  ;;  %v4597_v13 = vpop.f32.mrf.mxu1 }
 0x1b3   : > { %v821_v12 = vpop.f32.mrf.mxu0 }
 0x1b4   : > { %v1309_v47 = vadd.f32 %v1308_v6, %v4580_v57  ;;  %v1392_v16 = vadd.f32 %v1351_v10, %v1350_v17  ;;  %v4609_v11 = vadd.f32 %v1055_v0, %v821_v12  ;;  %v4611_v48 = vpop.f32.mrf.mxu1  ;;  %v1369_v10 = vadd.f32 %v1368_v26, %v1338_v53 }
 0x1b5   : > { %v3183_v15 = vpop.f32.mrf.mxu0  ;;  %v1286_v12 = vadd.f32 %v1285_v51, %v4601_v49  ;;  %v1339_v51 = vmul.f32 %v4601_v49, %v4601_v49  ;;  %v1382_v26 = vadd.f32 %v1381_v59, %v1346_v61 }
 0x1b6   : > { %5535 = vst [vmem:[#allocation34_spill] sm:$0xff] %v4609_v11  ;;  %v1393_v0 = vadd.f32 %v1392_v16, %v1352_v7  ;;  %v1310_v17 = vadd.f32 %v1309_v47, %v4591_v24  ;;  %v4626_v6 = vpop.f32.mrf.mxu1  ;;  %v1354_v18 = vmul.f32 %v4609_v11, %v4609_v11  ;;  %v4644_v16 = vadd.f32 %v4515_v4, %v4537_v22 }
 0x1b7   : > { %v824_v63 = vpop.f32.mrf.mxu0  ;;  %v1287_v59 = vadd.f32 %v1286_v12, %v4621_v44  ;;  %v4659_v61 = vadd.f32 %v4539_v23, %v3183_v15  ;;  %v1340_v12 = vmul.f32 %v4621_v44, %v4621_v44 }
 0x1b8   : > { %v1311_v50 = vadd.f32 %v1310_v17, %v4609_v11  ;;  %v1394_v9 = vadd.f32 %v1393_v0, %v1353_v33  ;;  %v4636_v7 = vadd.f32 %v4546_v58, %v824_v63  ;;  %v4638_v47 = vpop.f32.mrf.mxu1  ;;  %v4649_v17 = vadd.f32 %v4527_v20, %v3182_v25 }
 0x1b9   : > { %v3186_v53 = vpop.f32.mrf.mxu0  ;;  %v1301_v4 = vadd.f32 %v1300_v19, %v4644_v16  ;;  %5538 = vst [vmem:[#allocation37_spill] sm:$0xff] %v4659_v61  ;;  %v4664_v25 = vadd.f32 %v4505_v52, %v4513_v2 }
 0x1ba   : > { %5536 = vst [vmem:[#allocation35_spill] sm:$0xff] %v4636_v7  ;;  %5537 = vst [vmem:[#allocation36_spill] sm:$0xff] %v4649_v17  ;;  %v1395_v33 = vadd.f32 %v1394_v9, %v1354_v18  ;;  %v1312_v58 = vadd.f32 %v1311_v50, %v4636_v7  ;;  %v1355_v0 = vmul.f32 %v4636_v7, %v4636_v7  ;;  %v4654_v63 = vpop.f32.mrf.mxu1 }
 0x1bb   : > { %v837_v22 = vpop.f32.mrf.mxu0  ;;  %v1370_v50 = vadd.f32 %v1369_v10, %v1339_v51  ;;  %v1383_v18 = vadd.f32 %v1382_v26, %v1347_v40  ;;  %v1288_v15 = vadd.f32 %v1287_v59, %v4664_v25  ;;  %v1302_v52 = vrot.slane %v1301_v4, 4 }
 0x1bc   : > { %v1313_v11 = vadd.f32 %v1312_v58, %v4649_v17  ;;  %v3242_v20 = vpop.f32.mrf.mxu1  ;;  %v1396_v9 = vadd.f32 %v1395_v33, %v1355_v0  ;;  %v4670_v24 = vadd.f32 %v4562_v14, %v837_v22  ;;  %v1348_v58 = vmul.f32 %v4617_v5, %v4617_v5 }
 0x1bd   : > { %v3187_v7 = vpop.f32.mrf.mxu0  ;;  %v1356_v2 = vmul.f32 %v4649_v17, %v4649_v17  ;;  %v4678_v26 = vadd.f32 %v4555_v56, %v3186_v53  ;;  %v1341_v40 = vmul.f32 %v4664_v25, %v4664_v25  ;;  %v1371_v33 = vadd.f32 %v1370_v50, %v1340_v12 }
 0x1be   : > { %v1314_v19 = vadd.f32 %v1313_v11, %v4659_v61  ;;  %5539 = vst [vmem:[#allocation38_spill] sm:$0xff] %v4670_v24  ;;  %v1277_v23 = vpop.f32.mrf.mxu1  ;;  %v1384_v0 = vadd.f32 %v1383_v18, %v1348_v58  ;;  %v1358_v20 = vmul.f32 %v4670_v24, %v4670_v24  ;;  %v1289_v53 = vrot.slane %v1288_v15, 4 }
 0x1bf   : > { %v840_v10 = vpop.f32.mrf.mxu0  ;;  %v1397_v59 = vadd.f32 %v1396_v9, %v1356_v2  ;;  %v4688_v23 = vadd.f32 %v4573_v27, %v3187_v7  ;;  %v1303_v50 = vadd.f32 %v1302_v52, %v1301_v4  ;;  %v1357_v12 = vmul.f32 %v4659_v61, %v4659_v61 }
 0x1c0   : > { %v1315_v51 = vrot.slane %v1314_v19, 4  ;;  %v4681_v11 = vadd.f32 %v4584_v55, %v840_v10  ;;  %v3243_v14 = vpop.f32.mrf.mxu1  ;;  %v1349_v10 = vmul.f32 %v4644_v16, %v4644_v16  ;;  %v1360_v27 = vmul.f32 %v4678_v26, %v4678_v26 }
 0x1c1   : > { %v3190_v22 = vpop.f32.mrf.mxu0  ;;  %5541 = vst [vmem:[#allocation40_spill] sm:$0xff] %v4688_v23  ;;  %v1372_v2 = vadd.f32 %v1371_v33, %v1341_v40  ;;  %v1398_v17 = vadd.f32 %v1397_v59, %v1357_v12  ;;  %v1361_v4 = vmul.f32 %v4688_v23, %v4688_v23  ;;  %v1304_v1 = vrot.slane %v1303_v50, 2 }
 0x1c2   : > { %5540 = vst [vmem:[#allocation39_spill] sm:$0xff] %v4681_v11  ;;  %v1321_v56 = vadd.f32 %v4681_v11, %v4670_v24  ;;  %v1359_v55 = vmul.f32 %v4681_v11, %v4681_v11  ;;  %v1316_v18 = vadd.f32 %v1315_v51, %v1314_v19  ;;  %v1385_v14 = vadd.f32 %v1384_v0, %v1349_v10 }
 0x1c3   : > { %v853_v9 = vpop.f32.mrf.mxu0  ;;  %v1290_v51 = vadd.f32 %v1289_v53, %v1288_v15  ;;  %v1373_v59 = vrot.slane %v1372_v2, 4 }
 0x1c4   : > { %v1322_v7 = vadd.f32 %v1321_v56, %v4678_v26  ;;  %v1405_v58 = vadd.f32 %v1359_v55, %v1358_v20  ;;  %v4702_v11 = vadd.f32 %v4611_v48, %v853_v9  ;;  %v1317_v61 = vrot.slane %v1316_v18, 2 }
 0x1c5   : > { %v3191_v24 = vpop.f32.mrf.mxu0  ;;  %v4711_v48 = vadd.f32 %v4597_v13, %v3190_v22  ;;  %v1386_v20 = vrot.slane %v1385_v14, 4  ;;  %v1399_v55 = vrot.slane %v1398_v17, 4  ;;  %v1374_v22 = vadd.f32 %v1373_v59, %v1372_v2 }
 0x1c6   : > { %5542 = vst [vmem:[#allocation41_spill] sm:$0xff] %v4702_v11  ;;  %v1406_v19 = vadd.f32 %v1405_v58, %v1360_v27  ;;  %v1323_v52 = vadd.f32 %v1322_v7, %v4688_v23  ;;  %v1362_v40 = vmul.f32 %v4702_v11, %v4702_v11  ;;  %v1318_v15 = vadd.f32 %v1317_v61, %v1316_v18 }
 0x1c7   : > { %v856_v57 = vpop.f32.mrf.mxu0  ;;  %5543 = vst [vmem:[#allocation42_spill] sm:$0xff] %v4711_v48  ;;  %v4717_v53 = vadd.f32 %v4626_v6, %v3191_v24  ;;  %v1291_v27 = vrot.slane %v1290_v51, 2  ;;  %v1305_v7 = vadd.f32 %v1304_v1, %v1303_v50  ;;  %v1364_v13 = vmul.f32 %v4711_v48, %v4711_v48 }
 0x1c8   : > { %v1324_v56 = vadd.f32 %v1323_v52, %v4702_v11  ;;  %v1407_v33 = vadd.f32 %v1406_v19, %v1361_v4  ;;  %v4714_v0 = vadd.f32 %v4638_v47, %v856_v57  ;;  %v1387_v58 = vadd.f32 %v1386_v20, %v1385_v14 }
 0x1c9   : > { %5545 = vst [vmem:[#allocation44_spill] sm:$0xff] %v4717_v53  ;;  %v1400_v4 = vadd.f32 %v1399_v55, %v1398_v17  ;;  %v1454_v61 = vmul.f32 64.0, %v4654_v63  ;;  %v1319_v24 = vrot.slane %v1318_v15, 1  ;;  %v1365_v6 = vmul.f32 %v4717_v53, %v4717_v53 }
 0x1ca   : > { %5544 = vst [vmem:[#allocation43_spill] sm:$0xff] %v4714_v0  ;;  %v1408_v10 = vadd.f32 %v1407_v33, %v1362_v40  ;;  %v1325_v9 = vadd.f32 %v1324_v56, %v4714_v0  ;;  %v1363_v12 = vmul.f32 %v4714_v0, %v4714_v0  ;;  %v1292_v52 = vadd.f32 %v1291_v27, %v1290_v51 }
 0x1cb   : > { %v1306_v1 = vrot.slane %v1305_v7, 1  ;;  %v1375_v40 = vrot.slane %v1374_v22, 2  ;;  %v1388_v33 = vrot.slane %v1387_v58, 2  ;;  %v1401_v2 = vrot.slane %v1400_v4, 2 }
 0x1cc   : > { %v1326_v57 = vadd.f32 %v1325_v9, %v4711_v48  ;;  %v1409_v47 = vadd.f32 %v1408_v10, %v1363_v12  ;;  %v1456_v9 = vrot.slane %v1454_v61, 1  ;;  %v1457_v10 = vrot.slane %v1454_v61, 2 }
 0x1cd   : > { %v1320_v59 = vadd.f32 %v1319_v24, %v1318_v15  ;;  %v1293_v20 = vrot.slane %v1292_v52, 1  ;;  %v1307_v55 = vadd.f32 %v1306_v1, %v1305_v7  ;;  %v1376_v0 = vadd.f32 %v1375_v40, %v1374_v22 }
 0x1ce   : > { %v1327_v18 = vadd.f32 %v1326_v57, %v4717_v53  ;;  %v1410_v19 = vadd.f32 %v1409_v47, %v1364_v13  ;;  %v1389_v11 = vadd.f32 %v1388_v33, %v1387_v58  ;;  %v1402_v13 = vadd.f32 %v1401_v2, %v1400_v4 }
 0x1cf   : > { %v1464_v57 = vadd.f32 %v1456_v9, %v1307_v55  ;;  %v1465_v47 = vadd.f32 %v1457_v10, %v1320_v59  ;;  %v1458_v23 = vrot.slane %v1454_v61, 3  ;;  %v1418_v7 = vmul.f32 2.0, %v4654_v63 }
 0x1d0   : > { %v1328_v50 = vrot.slane %v1327_v18, 4  ;;  %v1411_v56 = vadd.f32 %v1410_v19, %v1365_v6  ;;  %v1294_v6 = vadd.f32 %v1293_v20, %v1292_v52  ;;  %v1440_v19 = vmul.f32 %v4654_v63, %v4654_v63 }
 0x1d1   : > { %v1390_v15 = vrot.slane %v1389_v11, 1  ;;  %v1471_v24 = vrot.slane %v1464_v57, 7  ;;  %v1473_v1 = vrot.slane %v1465_v47, 6  ;;  %v1403_v4 = vrot.slane %v1402_v13, 1 }
 0x1d2   : > { %v1329_v14 = vadd.f32 %v1328_v50, %v1327_v18  ;;  %v1412_v17 = vrot.slane %v1411_v56, 4  ;;  %v1377_v50 = vrot.slane %v1376_v0, 1  ;;  %v1423_v22 = vsel %vm1206_vm1, %v1307_v55, %v1294_v6 }
 0x1d3   : > { %v1424_v40 = vsel %vm1208_vm2, %v1320_v59, %v1423_v22  ;;  %v1441_v33 = vmul.f32 64.0, %v1440_v19  ;;  %v1404_v55 = vadd.f32 %v1403_v4, %v1402_v13 }
 0x1d4   : > { %v1330_v12 = vrot.slane %v1329_v14, 2  ;;  %v1413_v48 = vadd.f32 %v1412_v17, %v1411_v56  ;;  %v1463_v56 = vadd.f32 %v1454_v61, %v1294_v6 }
 0x1d5   : > { %v1444_v47 = vrot.slane %v1441_v33, 2  ;;  %v1445_v6 = vrot.slane %v1441_v33, 3 }
 0x1d6   : > { %v1331_v51 = vadd.f32 %v1330_v12, %v1329_v14  ;;  %v1414_v27 = vrot.slane %v1413_v48, 2  ;;  %v1378_v14 = vadd.f32 %v1377_v50, %v1376_v0  ;;  %v1391_v12 = vadd.f32 %v1390_v15, %v1389_v11 }
 0x1d8   : > { %v1332_v53 = vrot.slane %v1331_v51, 1  ;;  %v1415_v18 = vadd.f32 %v1414_v27, %v1413_v48  ;;  %v1472_v48 = vsel %vm1206_vm1, %v1471_v24, %v1463_v56  ;;  %v1443_v27 = vrot.slane %v1441_v33, 1 }
 0x1d9   : > { %v1474_v17 = vsel %vm1208_vm2, %v1473_v1, %v1472_v48  ;;  %v5546_v56 = vmov 0.0  }
 0x1da   : > { %v1333_v58 = vadd.f32 %v1332_v53, %v1331_v51  ;;  %v1416_v52 = vrot.slane %v1415_v18, 1 }
 0x1dc   : > { %v1425_v9 = vsel %vm1210_vm3, %v1333_v58, %v1424_v40  ;;  %v1466_v10 = vadd.f32 %v1458_v23, %v1333_v58  ;;  %v1417_v53 = vadd.f32 %v1416_v52, %v1415_v18 }
 0x1dd   : > { %v1427_v2 = vmul.f32 %v1425_v9, %v1418_v7 }
 0x1de   : > { %v1475_v20 = vrot.slane %v1466_v10, 5  ;;  %v1655_v10 = vlaneseq }
 0x1df   : > { %v1429_v57 = vrot.slane %v1427_v2, 1  ;;  %v1430_v51 = vrot.slane %v1427_v2, 2  ;;  %v1431_v61 = vrot.slane %v1427_v2, 3  ;;  %v1436_v23 = vadd.f32 %v1427_v2, %v1378_v14  ;;  %v2981_v14 = vld [vmem:[%s5455_s6] ss:$0 sm:$0xff] }
 0x1e0   : > { %v1476_v59 = vsel %vm1210_vm3, %v1475_v20, %v1474_v17  ;;  %v1656_v48 = vshrl.u32 %v1655_v10, 7 }
 0x1e1   : > { %3277 = vmatmul.mubr.f32.vlgmr.msra.gmra.mxu0 %v1476_v59  ;;  %v1437_v19 = vadd.f32 %v1429_v57, %v1391_v12  ;;  %v1438_v7 = vadd.f32 %v1430_v51, %v1404_v55  ;;  %v1439_v24 = vadd.f32 %v1431_v61, %v1417_v53  ;;  %v1450_v58 = vadd.f32 %v1441_v33, %v1436_v23  ;;  %v2982_v55 = vld [vmem:[%s5456_s7] ss:$0 sm:$0xff] }
 0x1e2   : > { %v3868_v33 = vmov 1966171168   ;;  %v4784_v51 = vsub.s32 0, %v1656_v48 }
 0x1e3   : > { %v1451_v0 = vadd.f32 %v1443_v27, %v1437_v19  ;;  %v1452_v50 = vadd.f32 %v1444_v47, %v1438_v7  ;;  %v1453_v22 = vadd.f32 %v1445_v6, %v1439_v24  ;;  %v1653_v9 = vunpack.c.l.s4 %v3868_v33 }
 0x1e5   : > { %v1552_v11 = vrot.slane %v1451_v0, 7  ;;  %v1554_v13 = vrot.slane %v1452_v50, 6  ;;  %v1556_v15 = vrot.slane %v1453_v22, 5  ;;  %v1654_v2 = vunpack.c.0.s8 %v1653_v9  ;;  %v5548_v22 = vld [vmem:[#allocation29_spill] sm:$0xff] }
 0x1e7   : > { %v1553_v18 = vsel %vm1206_vm1, %v1552_v11, %v1450_v58  ;;  %v4778_v17 = vsub.s32 %v1654_v2, %v1656_v48 }
 0x1e8   : > { %v1555_v1 = vsel %vm1208_vm2, %v1554_v13, %v1553_v18  ;;  %v5549_v18 = vld [vmem:[#allocation27_spill] sm:$0xff] }
 0x1e9   : > { %v1557_v4 = vsel %vm1210_vm3, %v1556_v15, %v1555_v1  ;;  %v5550_v1 = vld [vmem:[#allocation30_spill] sm:$0xff] }
 0x1ea   : > { %3312 = vmatmul.mubr.f32.vlgmr.msra.gmra.mxu1 %v1557_v4 }
 0x1eb   : > { %3363 = vmatpush3.msra.mxu1 %v4408_v28  ;;  %3394 = vmatprep.mubr.msk.f32.mxu1 %vm3867_vm4, %v5546_v56  ;;  %v5547_v28 = vld [vmem:[#allocation25_spill] sm:$0xff] }
 0x1ec   : > { %3364 = vmatprep.subr.mxu1 %v5546_v56 }
 0x1ed   : > { %3365 = vmatpush3.msra.mxu1 %v4410_v29  ;;  %v3559_v29 = vld [vmem:[#allocation11 + $0x38] sm:$0xff]  }
 0x1ee   : > { %3366 = vmatprep.subr.mxu1 %v5546_v56  ;;  %3314 = vmatprep.subr.bf16.mxu0 %v3559_v29 }
 0x1ef   : > { %3367 = vmatpush3.msra.mxu1 %v4415_v30  ;;  %3315 = vmatpush3.bf16.msra.mxu0 %v3559_v29  ;;  %v3560_v30 = vld [vmem:[#allocation11 + $0x30] sm:$0xff]  }
 0x1f0   : > { %3368 = vmatprep.subr.mxu1 %v5546_v56  ;;  %3316 = vmatprep.subr.bf16.mxu0 %v3560_v30 }
 0x1f1   : > { %3369 = vmatpush3.msra.mxu1 %v4421_v31  ;;  %v3561_v31 = vld [vmem:[#allocation11 + $0x28] sm:$0xff]  }
 0x1f2   : > { %3370 = vmatprep.subr.mxu1 %v5546_v56 }
 0x1f3   : > { %3371 = vmatpush3.msra.mxu1 %v4432_v32  ;;  %3317 = vmatpush3.bf16.msra.mxu0 %v3560_v30  ;;  %v3562_v32 = vld [vmem:[#allocation11 + $0x20] sm:$0xff]  }
 0x1f4   : > { %3372 = vmatprep.subr.mxu1 %v5546_v56  ;;  %3318 = vmatprep.subr.bf16.mxu0 %v3561_v31 }
 0x1f5   : > { %3373 = vmatpush3.msra.mxu1 %v4434_v34  ;;  %v3563_v34 = vld [vmem:[#allocation11 + $0x18] sm:$0xff]  }
 0x1f6   : > { %3374 = vmatprep.subr.mxu1 %v5546_v56 }
 0x1f7   : > { %3375 = vmatpush3.msra.mxu1 %v4439_v35  ;;  %3319 = vmatpush3.bf16.msra.mxu0 %v3561_v31  ;;  %v3564_v35 = vld [vmem:[#allocation11 + $0x10] sm:$0xff]  }
 0x1f8   : > { %3376 = vmatprep.subr.mxu1 %v5546_v56  ;;  %3320 = vmatprep.subr.bf16.mxu0 %v3562_v32 }
 0x1f9   : > { %3377 = vmatpush3.msra.mxu1 %v4445_v36  ;;  %v3565_v36 = vld [vmem:[#allocation11 + $0x8] sm:$0xff]  }
 0x1fa   : > { %3378 = vmatprep.subr.mxu1 %v5546_v56 }
 0x1fb   : > { %3379 = vmatpush3.msra.mxu1 %v4456_v37  ;;  %3321 = vmatpush3.bf16.msra.mxu0 %v3562_v32  ;;  %v3566_v37 = vld [vmem:[#allocation11] sm:$0xff]  }
 0x1fc   : > { %3380 = vmatprep.subr.mxu1 %v5546_v56  ;;  %3322 = vmatprep.subr.bf16.mxu0 %v3563_v34 }
 0x1fd   : > { %3381 = vmatpush3.msra.mxu1 %v4461_v39 }
 0x1fe   : > { %3382 = vmatprep.subr.mxu1 %v5546_v56 }
 0x1ff   : > { %3383 = vmatpush3.msra.mxu1 %v4465_v41  ;;  %3323 = vmatpush3.bf16.msra.mxu0 %v3563_v34 }
 0x200   : > { %3384 = vmatprep.subr.mxu1 %v5546_v56  ;;  %3324 = vmatprep.subr.bf16.mxu0 %v3564_v35 }
 0x201   : > { %3385 = vmatpush3.msra.mxu1 %v4469_v42 }
 0x202   : > { %3386 = vmatprep.subr.mxu1 %v5546_v56 }
 0x203   : > { %3387 = vmatpush3.msra.mxu1 %v4475_v54  ;;  %3325 = vmatpush3.bf16.msra.mxu0 %v3564_v35  ;;  %v5551_v35 = vld [vmem:[#allocation28_spill] sm:$0xff] }
 0x204   : > { %3388 = vmatprep.subr.mxu1 %v5546_v56  ;;  %3326 = vmatprep.subr.bf16.mxu0 %v3565_v36 }
 0x205   : > { %3389 = vmatpush3.msra.mxu1 %v4481_v62 }
 0x206   : > { %3390 = vmatprep.subr.mxu1 %v5546_v56 }
 0x207   : > { %3391 = vmatpush3.msra.mxu1 %v4487_v43  ;;  %3327 = vmatpush3.bf16.msra.mxu0 %v3565_v36 }
 0x208   : > { %3392 = vmatprep.subr.mxu1 %v5546_v56  ;;  %3328 = vmatprep.subr.bf16.mxu0 %v3566_v37 }
 0x209   : > { %3393 = vmatpush3.msra.mxu1 %v5547_v28 }
 0x20a   : > { %3397 = vmatprep.subr.mxu1 %v5546_v56 }
 0x20b   : > { %3329 = vmatpush3.bf16.msra.mxu0 %v3566_v37  ;;  %v5552_v37 = vld [vmem:[#allocation26_spill] sm:$0xff] }
 0x2a1   : > { %v1544_v39 = vpop.f32.mrf.mxu0 }
 0x2a2   : > { %v1629_v42 = vmul.f32 %v1544_v39, %v1544_v39 }
 0x2a3   : > { %v3278_v41 = vpop.f32.mrf.mxu0 }
 0x2aa   : > { %v1625_v54 = vpop.f32.mrf.mxu1 }
 0x2ab   : > { %v1630_v62 = vsub.f32 %v1625_v54, %v1629_v42 }
 0x2ac   : > { %v3313_v43 = vpop.f32.mrf.mxu1 }
 0x2ad   : > { %v1631_v40 = vmax.f32 %v1630_v62, 0.0 }
 0x2af   : > { %v1632_v52 = vadd.f32 1e-05, %v1631_v40 }
 0x2b1   : > { %3567 = vrsqrt.f32 %v1632_v52 }
 0x2be   : > { %v3568_v20 = vpop.eup %3567 }
 0x2bf   : > { %v1640_v12 = vmul.f32 %v3568_v20, %v2981_v14 }
 0x2c1   : > { %v1641_v53 = vmul.f32 %v1640_v12, %v1544_v39  ;;  %v1658_v57 = vrot.slane %v1640_v12, %v4778_v17  ;;  %v1649_v27 = vmul.f32 %v1640_v12, %v4654_v63 }
 0x2c3   : > { %v1648_v61 = vsub.f32 %v2982_v55, %v1641_v53  ;;  %v1659_v59 = vcombine.high %v1658_v57, %v1658_v57  ;;  %v4788_v47 = vrot.slane %v1658_v57, %v4778_v17 }
 0x2c5   : > { %v1650_v6 = vadd.f32 %v1649_v27, %v1648_v61  ;;  %v4791_v23 = vrot.slane %v1659_v59, %v4778_v17  ;;  %v1679_v19 = vrot.slane %v4788_v47, %v4784_v51  ;;  %v1674_v50 = vcombine.high %v4788_v47, %v4788_v47 }
 0x2c7   : > { %v1735_v7 = vrot.slane %v1650_v6, %v4778_v17  ;;  %v4798_v24 = vrot.slane %v4791_v23, %v4784_v51  ;;  %v1696_v58 = vmul.f32 %v1679_v19, %v5548_v22  ;;  %v1697_v15 = vmul.f32 %v1679_v19, %v5549_v18 }
 0x2c8   : > { %v1698_v4 = vmul.f32 %v1679_v19, %v5550_v1  ;;  %v1699_v28 = vmul.f32 %v1679_v19, %v4557_v8  ;;  %v1700_v29 = vmul.f32 %v1679_v19, %v4569_v46  ;;  %v1701_v30 = vmul.f32 %v1679_v19, %v4601_v49 }
 0x2c9   : > { %v1736_v0 = vcombine.high %v1735_v7, %v1735_v7  ;;  %v4801_v63 = vrot.slane %v1735_v7, %v4778_v17  ;;  %v1702_v31 = vmul.f32 %v1679_v19, %v4621_v44  ;;  %v1703_v34 = vmul.f32 %v1679_v19, %v4664_v25 }
 0x2ca   : > { %v1704_v36 = vmul.f32 %v4798_v24, %v5551_v35  ;;  %v1705_v39 = vmul.f32 %v4798_v24, %v5552_v37  ;;  %v1710_v47 = vmul.f32 %v4798_v24, %v4617_v5 }
 0x2cb   : > { %v4807_v11 = vrot.slane %v1736_v0, %v4778_v17  ;;  %v1756_v13 = vrot.slane %v4801_v63, %v4784_v51  ;;  %v1751_v57 = vcombine.high %v4801_v63, %v4801_v63  ;;  %v1706_v0 = vmul.f32 %v4798_v24, %v4535_v21 }
 0x2cc   : > { %v1707_v63 = vmul.f32 %v4798_v24, %v4551_v38 }
 0x2cd   : > { %v1773_v32 = vadd.f32 %v1756_v13, %v1696_v58  ;;  %v1774_v41 = vadd.f32 %v1756_v13, %v1697_v15  ;;  %v1775_v42 = vadd.f32 %v1756_v13, %v1698_v4  ;;  %v1776_v54 = vadd.f32 %v1756_v13, %v1699_v28 }
 0x2ce   : > { %v1777_v62 = vadd.f32 %v1756_v13, %v1700_v29  ;;  %v4824_v8 = vrot.slane %v4807_v11, %v4784_v51  ;;  %v1778_v49 = vadd.f32 %v1756_v13, %v1701_v30  ;;  %v1779_v14 = vadd.f32 %v1756_v13, %v1702_v31 }
 0x2cf   : > { %vm1805_vm5 = vcmp.ge.f32.partialorder %v1773_v32, 0.0  ;;  %v1837_v46 = vmul.f32 0.1, %v1773_v32  ;;  %vm1806_vm6 = vcmp.ge.f32.partialorder %v1774_v41, 0.0  ;;  %v1838_v44 = vmul.f32 0.1, %v1774_v41 }
 0x2d0   : > { %vm1807_vm7 = vcmp.ge.f32.partialorder %v1775_v42, 0.0  ;;  %vm1808_vm8 = vcmp.ge.f32.partialorder %v1776_v54, 0.0  ;;  %v1839_v43 = vmul.f32 0.1, %v1775_v42  ;;  %v1840_v40 = vmul.f32 0.1, %v1776_v54 }
 0x2d1   : > { %v1869_v25 = vsel %vm1805_vm5, %v1773_v32, %v1837_v46  ;;  %vm1809_vm9 = vcmp.ge.f32.partialorder %v1777_v62, 0.0  ;;  %v1870_v52 = vsel %vm1806_vm6, %v1774_v41, %v1838_v44  ;;  %vm1810_vm10 = vcmp.ge.f32.partialorder %v1778_v49, 0.0 }
 0x2d2   : > { %v1841_v33 = vmul.f32 0.1, %v1777_v62  ;;  %v1842_v9 = vmul.f32 0.1, %v1778_v49  ;;  %v1901_v10 = vpack.c.bf16 %v1870_v52, %v1869_v25  ;;  %v1871_v2 = vsel %vm1807_vm7, %v1775_v42, %v1839_v43 }
 0x2d3   : > { %v1872_v48 = vsel %vm1808_vm8, %v1776_v54, %v1840_v40  ;;  %v1780_v53 = vadd.f32 %v1756_v13, %v1703_v34  ;;  %v1843_v27 = vmul.f32 0.1, %v1779_v14  ;;  %v1781_v59 = vadd.f32 %v4824_v8, %v1704_v36 }
 0x2d4   : > { %v1902_v20 = vpack.c.bf16 %v1872_v48, %v1871_v2  ;;  %v1873_v12 = vsel %vm1809_vm9, %v1777_v62, %v1841_v33  ;;  %v1874_v55 = vsel %vm1810_vm10, %v1778_v49, %v1842_v9  ;;  %3330 = vmatprep.mubr.bf16.mxu0 %v1901_v10  ;;  %vm1811_vm11 = vcmp.ge.f32.partialorder %v1779_v14, 0.0  ;;  %v5554_v33 = vld [vmem:[#allocation31_spill] sm:$0xff]  ;;  %v5555_v9 = vld [vmem:[#allocation33_spill] sm:$0xff] }
 0x2d5   : > { %v1903_v61 = vpack.c.bf16 %v1874_v55, %v1873_v12  ;;  %vm1812_vm12 = vcmp.ge.f32.partialorder %v1780_v53, 0.0  ;;  %v1844_v6 = vmul.f32 0.1, %v1780_v53  ;;  %v1782_v19 = vadd.f32 %v4824_v8, %v1705_v39  ;;  %v5553_v39 = vld [vmem:[#allocation32_spill] sm:$0xff]  ;;  %v5557_v12 = vld [vmem:[#allocation35_spill] sm:$0xff] }
 0x2d6   : > { %3331 = vmatmul.mubr.bf16.vlgmr.msra.gmra.mxu0 %v1902_v20  ;;  %vm1813_vm13 = vcmp.ge.f32.partialorder %v1781_v59, 0.0  ;;  %v1845_v7 = vmul.f32 0.1, %v1781_v59  ;;  %v1708_v58 = vmul.f32 %v4798_v24, %v4567_v45  ;;  %v1709_v13 = vmul.f32 %v4798_v24, %v4578_v3 }
 0x2d7   : > { %3334 = vmatprep.mubr.bf16.mxu0 %v1903_v61  ;;  %vm1814_vm14 = vcmp.ge.f32.partialorder %v1782_v19, 0.0  ;;  %v1846_v22 = vmul.f32 0.1, %v1782_v19  ;;  %v1875_v18 = vsel %vm1811_vm11, %v1779_v14, %v1843_v27  ;;  %v1876_v15 = vsel %vm1812_vm12, %v1780_v53, %v1844_v6  ;;  %v5556_v14 = vld [vmem:[#allocation34_spill] sm:$0xff] }
 0x2d8   : > { %v1783_v1 = vadd.f32 %v4824_v8, %v1706_v0  ;;  %v1784_v4 = vadd.f32 %v4824_v8, %v1707_v63  ;;  %v1877_v28 = vsel %vm1813_vm13, %v1781_v59, %v1845_v7  ;;  %v1785_v21 = vadd.f32 %v4824_v8, %v1708_v58 }
 0x2d9   : > { %v1878_v29 = vsel %vm1814_vm14, %v1782_v19, %v1846_v22  ;;  %v1786_v38 = vadd.f32 %v4824_v8, %v1709_v13  ;;  %v4846_v45 = vrot.slane %v1674_v50, %v4784_v51  ;;  %v1904_v30 = vpack.c.bf16 %v1876_v15, %v1875_v18  ;;  %v5558_v15 = vld [vmem:[#allocation36_spill] sm:$0xff] }
 0x2da   : > { %v4849_v3 = vrot.slane %v1751_v57, %v4784_v51  ;;  %v1905_v31 = vpack.c.bf16 %v1878_v29, %v1877_v28  ;;  %v1847_v32 = vmul.f32 0.1, %v1783_v1  ;;  %v1848_v34 = vmul.f32 0.1, %v1784_v4  ;;  %v5560_v29 = vld [vmem:[#allocation38_spill] sm:$0xff] }
 0x2db   : > { %vm1815_vm15 = vcmp.ge.f32.partialorder %v1783_v1, 0.0  ;;  %vm1816_vm0 = vcmp.ge.f32.partialorder %v1784_v4, 0.0  ;;  %v1849_v35 = vmul.f32 0.1, %v1785_v21  ;;  %v1850_v36 = vmul.f32 0.1, %v1786_v38 }
 0x2dc   : > { %vm1817_vm5 = vcmp.ge.f32.partialorder %v1785_v21, 0.0  ;;  %vm1818_vm6 = vcmp.ge.f32.partialorder %v1786_v38, 0.0  ;;  %v1711_v50 = vmul.f32 %v4798_v24, %v4644_v16  ;;  %v1712_v37 = vmul.f32 %v4846_v45, %v4571_v60 }
 0x2dd   : > { %v1713_v41 = vmul.f32 %v4846_v45, %v5553_v39  ;;  %v1879_v42 = vsel %vm1815_vm15, %v1783_v1, %v1847_v32  ;;  %v1880_v54 = vsel %vm1816_vm0, %v1784_v4, %v1848_v34  ;;  %v1787_v62 = vadd.f32 %v4824_v8, %v1710_v47  ;;  %v5559_v4 = vld [vmem:[#allocation37_spill] sm:$0xff] }
 0x2de   : > { %3335 = vmatmul.mubr.bf16.gmra.mxu0 %v1904_v30  ;;  %v1788_v46 = vadd.f32 %v4824_v8, %v1711_v50  ;;  %v1881_v49 = vsel %vm1817_vm5, %v1785_v21, %v1849_v35  ;;  %v1882_v44 = vsel %vm1818_vm6, %v1786_v38, %v1850_v36  ;;  %v1789_v25 = vadd.f32 %v4849_v3, %v1712_v37  ;;  %v5561_v38 = vld [vmem:[#allocation39_spill] sm:$0xff] }
 0x2df   : > { %3338 = vmatprep.mubr.bf16.mxu0 %v1905_v31  ;;  %v1790_v5 = vadd.f32 %v4849_v3, %v1713_v41  ;;  %v1906_v43 = vpack.c.bf16 %v1880_v54, %v1879_v42  ;;  %v1907_v16 = vpack.c.bf16 %v1882_v44, %v1881_v49  ;;  %v1851_v24 = vmul.f32 0.1, %v1787_v62  ;;  %v5563_v44 = vld [vmem:[#allocation41_spill] sm:$0xff] }
 0x2e0   : > { %v1852_v40 = vmul.f32 0.1, %v1788_v46  ;;  %vm1819_vm7 = vcmp.ge.f32.partialorder %v1787_v62, 0.0  ;;  %vm1820_vm8 = vcmp.ge.f32.partialorder %v1788_v46, 0.0  ;;  %v1853_v60 = vmul.f32 0.1, %v1789_v25 }
 0x2e1   : > { %v1854_v52 = vmul.f32 0.1, %v1790_v5  ;;  %vm1821_vm9 = vcmp.ge.f32.partialorder %v1789_v25, 0.0  ;;  %vm1822_vm10 = vcmp.ge.f32.partialorder %v1790_v5, 0.0  ;;  %v1714_v8 = vmul.f32 %v4846_v45, %v5554_v33 }
 0x2e2   : > { %v1715_v10 = vmul.f32 %v4846_v45, %v5555_v9  ;;  %v1675_v2 = vcombine.high %v4791_v23, %v4791_v23  ;;  %v1752_v48 = vcombine.high %v4807_v11, %v4807_v11  ;;  %v1716_v20 = vmul.f32 %v4846_v45, %v5556_v14 }
 0x2e3   : > { %v1717_v55 = vmul.f32 %v4846_v45, %v5557_v12  ;;  %v1883_v53 = vsel %vm1819_vm7, %v1787_v62, %v1851_v24  ;;  %v1884_v57 = vsel %vm1820_vm8, %v1788_v46, %v1852_v40  ;;  %v1791_v61 = vadd.f32 %v4849_v3, %v1714_v8  ;;  %v5562_v46 = vld [vmem:[#allocation40_spill] sm:$0xff]  ;;  %v5565_v12 = vld [vmem:[#allocation42_spill] sm:$0xff] }
 0x2e4   : > { %v1792_v27 = vadd.f32 %v4849_v3, %v1715_v10  ;;  %v1885_v59 = vsel %vm1821_vm9, %v1789_v25, %v1853_v60  ;;  %v1886_v6 = vsel %vm1822_vm10, %v1790_v5, %v1854_v52  ;;  %v1793_v19 = vadd.f32 %v4849_v3, %v1716_v20  ;;  %v5564_v5 = vld [vmem:[#allocation43_spill] sm:$0xff] }
 0x2e5   : > { %v1794_v23 = vadd.f32 %v4849_v3, %v1717_v55  ;;  %v4880_v11 = vrot.slane %v1675_v2, %v4784_v51  ;;  %v1908_v7 = vpack.c.bf16 %v1884_v57, %v1883_v53  ;;  %v4883_v0 = vrot.slane %v1752_v48, %v4784_v51  ;;  %v5566_v53 = vld [vmem:[#allocation44_spill] sm:$0xff] }
 0x2e6   : > { %3339 = vmatmul.mubr.bf16.gmra.mxu0 %v1906_v43  ;;  %v1909_v63 = vpack.c.bf16 %v1886_v6, %v1885_v59  ;;  %v1855_v22 = vmul.f32 0.1, %v1791_v61  ;;  %v1856_v58 = vmul.f32 0.1, %v1792_v27  ;;  %vm1823_vm11 = vcmp.ge.f32.partialorder %v1791_v61, 0.0 }
 0x2e7   : > { %3342 = vmatprep.mubr.bf16.mxu0 %v1907_v16  ;;  %vm1824_vm12 = vcmp.ge.f32.partialorder %v1792_v27, 0.0  ;;  %v1857_v13 = vmul.f32 0.1, %v1793_v19  ;;  %v1858_v18 = vmul.f32 0.1, %v1794_v23  ;;  %vm1825_vm13 = vcmp.ge.f32.partialorder %v1793_v19, 0.0 }
 0x2e8   : > { %vm1826_vm14 = vcmp.ge.f32.partialorder %v1794_v23, 0.0  ;;  %v1718_v1 = vmul.f32 %v4846_v45, %v5558_v15  ;;  %v1719_v28 = vmul.f32 %v4846_v45, %v5559_v4  ;;  %v1720_v21 = vmul.f32 %v4880_v11, %v5560_v29 }
 0x2e9   : > { %v1721_v30 = vmul.f32 %v4880_v11, %v5561_v38  ;;  %v1887_v31 = vsel %vm1823_vm11, %v1791_v61, %v1855_v22  ;;  %v1888_v32 = vsel %vm1824_vm12, %v1792_v27, %v1856_v58  ;;  %v1889_v36 = vsel %vm1825_vm13, %v1793_v19, %v1857_v13 }
 0x2ea   : > { %v1795_v34 = vadd.f32 %v4849_v3, %v1718_v1  ;;  %v1796_v35 = vadd.f32 %v4849_v3, %v1719_v28  ;;  %v1890_v47 = vsel %vm1826_vm14, %v1794_v23, %v1858_v18  ;;  %v1797_v50 = vadd.f32 %v4883_v0, %v1720_v21 }
 0x2eb   : > { %v1798_v37 = vadd.f32 %v4883_v0, %v1721_v30  ;;  %v1910_v39 = vpack.c.bf16 %v1888_v32, %v1887_v31  ;;  %v1911_v45 = vpack.c.bf16 %v1890_v47, %v1889_v36  ;;  %v1722_v3 = vmul.f32 %v4880_v11, %v4678_v26 }
 0x2ec   : > { %v1859_v41 = vmul.f32 0.1, %v1795_v34  ;;  %v1860_v42 = vmul.f32 0.1, %v1796_v35  ;;  %vm1827_vm15 = vcmp.ge.f32.partialorder %v1795_v34, 0.0  ;;  %vm1828_vm0 = vcmp.ge.f32.partialorder %v1796_v35, 0.0 }
 0x2ed   : > { %v1861_v54 = vmul.f32 0.1, %v1797_v50  ;;  %v1862_v62 = vmul.f32 0.1, %v1798_v37  ;;  %vm1829_vm5 = vcmp.ge.f32.partialorder %v1797_v50, 0.0  ;;  %vm1830_vm6 = vcmp.ge.f32.partialorder %v1798_v37, 0.0 }
 0x2ee   : > { %3343 = vmatmul.mubr.bf16.gmra.mxu0 %v1908_v7  ;;  %v1723_v49 = vmul.f32 %v4880_v11, %v5562_v46  ;;  %v1724_v25 = vmul.f32 %v4880_v11, %v5563_v44  ;;  %v1725_v43 = vmul.f32 %v4880_v11, %v5564_v5  ;;  %v1891_v16 = vsel %vm1827_vm15, %v1795_v34, %v1859_v41 }
 0x2ef   : > { %3346 = vmatprep.mubr.bf16.mxu0 %v1909_v63  ;;  %v1892_v24 = vsel %vm1828_vm0, %v1796_v35, %v1860_v42  ;;  %v1799_v40 = vadd.f32 %v4883_v0, %v1722_v3  ;;  %v1893_v52 = vsel %vm1829_vm5, %v1797_v50, %v1861_v54  ;;  %v1894_v33 = vsel %vm1830_vm6, %v1798_v37, %v1862_v62 }
 0x2f0   : > { %v1800_v60 = vadd.f32 %v4883_v0, %v1723_v49  ;;  %v1801_v8 = vadd.f32 %v4883_v0, %v1724_v25  ;;  %v1802_v26 = vadd.f32 %v4883_v0, %v1725_v43  ;;  %v1912_v9 = vpack.c.bf16 %v1892_v24, %v1891_v16 }
 0x2f1   : > { %v1913_v10 = vpack.c.bf16 %v1894_v33, %v1893_v52  ;;  %v1863_v2 = vmul.f32 0.1, %v1799_v40  ;;  %vm1831_vm7 = vcmp.ge.f32.partialorder %v1799_v40, 0.0  ;;  %v1726_v55 = vmul.f32 %v4880_v11, %v5565_v12 }
 0x2f2   : > { %v1864_v48 = vmul.f32 0.1, %v1800_v60  ;;  %vm1832_vm8 = vcmp.ge.f32.partialorder %v1800_v60, 0.0  ;;  %v1865_v14 = vmul.f32 0.1, %v1801_v8  ;;  %vm1833_vm9 = vcmp.ge.f32.partialorder %v1801_v8, 0.0 }
 0x2f3   : > { %v1866_v20 = vmul.f32 0.1, %v1802_v26  ;;  %vm1834_vm10 = vcmp.ge.f32.partialorder %v1802_v26, 0.0  ;;  %v1727_v57 = vmul.f32 %v4880_v11, %v5566_v53  ;;  %v1895_v61 = vsel %vm1831_vm7, %v1799_v40, %v1863_v2 }
 0x2f4   : > { %v1896_v27 = vsel %vm1832_vm8, %v1800_v60, %v1864_v48  ;;  %v1803_v59 = vadd.f32 %v4883_v0, %v1726_v55  ;;  %v1897_v19 = vsel %vm1833_vm9, %v1801_v8, %v1865_v14 }
 0x2f5   : > { %v1804_v6 = vadd.f32 %v4883_v0, %v1727_v57  ;;  %v1898_v23 = vsel %vm1834_vm10, %v1802_v26, %v1866_v20  ;;  %v1914_v7 = vpack.c.bf16 %v1896_v27, %v1895_v61 }
 0x2f6   : > { %3347 = vmatmul.mubr.bf16.gmra.mxu0 %v1910_v39  ;;  %v1915_v63 = vpack.c.bf16 %v1898_v23, %v1897_v19  ;;  %v1867_v22 = vmul.f32 0.1, %v1803_v59  ;;  %vm1835_vm11 = vcmp.ge.f32.partialorder %v1803_v59, 0.0 }
 0x2f7   : > { %3350 = vmatprep.mubr.bf16.mxu0 %v1911_v45  ;;  %v1868_v58 = vmul.f32 0.1, %v1804_v6  ;;  %vm1836_vm12 = vcmp.ge.f32.partialorder %v1804_v6, 0.0 }
 0x2f8   : > { %v1899_v13 = vsel %vm1835_vm11, %v1803_v59, %v1867_v22 }
 0x2f9   : > { %v1900_v18 = vsel %vm1836_vm12, %v1804_v6, %v1868_v58 }
 0x2fa   : > { %v1916_v15 = vpack.c.bf16 %v1900_v18, %v1899_v13 }
 0x2fe   : > { %3351 = vmatmul.mubr.bf16.gmra.mxu0 %v1912_v9 }
 0x2ff   : > { %3354 = vmatprep.mubr.bf16.mxu0 %v1913_v10 }
 0x306   : > { %3355 = vmatmul.mubr.bf16.gmra.mxu0 %v1914_v7 }
 0x307   : > { %3358 = vmatprep.mubr.bf16.mxu0 %v1915_v63 }
 0x30e   : > { %3359 = vmatmul.mubr.bf16.gmra.mxu0 %v1916_v15 }
 0x396   : > { %v4915_v11 = vpop.f32.mrf.mxu0 }
 0x398   : > { %v4917_v1 = vpop.f32.mrf.mxu0 }
 0x399   : > { %v2196_v23 = vmul.f32 %v4917_v1, %v4917_v1 }
 0x39a   : > { %v4919_v4 = vpop.f32.mrf.mxu0 }
 0x39c   : > { %v4921_v0 = vpop.f32.mrf.mxu0 }
 0x39d   : > { %v2144_v37 = vadd.f32 %v4921_v0, %v4917_v1  ;;  %v2197_v61 = vmul.f32 %v4921_v0, %v4921_v0 }
 0x39e   : > { %v4923_v28 = vpop.f32.mrf.mxu0 }
 0x39f   : > { %v2145_v42 = vadd.f32 %v4915_v11, %v2144_v37 }
 0x3a0   : > { %v4925_v29 = vpop.f32.mrf.mxu0 }
 0x3a1   : > { %v2146_v46 = vadd.f32 %v4919_v4, %v2145_v42 }
 0x3a2   : > { %v4927_v21 = vpop.f32.mrf.mxu0 }
 0x3a3   : > { %v2147_v43 = vadd.f32 %v2146_v46, %v4925_v29 }
 0x3a4   : > { %v4929_v38 = vpop.f32.mrf.mxu0 }
 0x3a5   : > { %v2148_v33 = vadd.f32 %v2147_v43, %v4929_v38 }
 0x3a6   : > { %v4931_v30 = vpop.f32.mrf.mxu0 }
 0x3a7   : > { %v2149_v48 = vadd.f32 %v4923_v28, %v2148_v33  ;;  %v2206_v43 = vmul.f32 %v4931_v30, %v4931_v30 }
 0x3a8   : > { %v4933_v31 = vpop.f32.mrf.mxu0 }
 0x3a9   : > { %v2150_v57 = vadd.f32 %v4927_v21, %v2149_v48  ;;  %v2204_v7 = vmul.f32 %v4933_v31, %v4933_v31 }
 0x3aa   : > { %v4935_v32 = vpop.f32.mrf.mxu0 }
 0x3ab   : > { %v2151_v13 = vrot.slane %v2150_v57, 4 }
 0x3ac   : > { %v4937_v34 = vpop.f32.mrf.mxu0 }
 0x3ad   : > { %v2157_v47 = vadd.f32 %v4937_v34, %v4933_v31  ;;  %v2205_v27 = vmul.f32 %v4937_v34, %v4937_v34  ;;  %v2152_v33 = vadd.f32 %v2151_v13, %v2150_v57  ;;  %v2207_v57 = vmul.f32 %v4935_v32, %v4935_v32 }
 0x3ae   : > { %v4939_v35 = vpop.f32.mrf.mxu0 }
 0x3af   : > { %v2158_v45 = vadd.f32 %v4931_v30, %v2157_v47  ;;  %v2228_v47 = vadd.f32 %v2197_v61, %v2196_v23  ;;  %v2241_v37 = vadd.f32 %v2205_v27, %v2204_v7  ;;  %v2153_v7 = vrot.slane %v2152_v33, 2 }
 0x3b0   : > { %v4941_v36 = vpop.f32.mrf.mxu0 }
 0x3b1   : > { %v2159_v62 = vadd.f32 %v4935_v32, %v2158_v45  ;;  %v2242_v48 = vadd.f32 %v2241_v37, %v2206_v43 }
 0x3b2   : > { %v4945_v50 = vpop.f32.mrf.mxu0 }
 0x3b3   : > { %v2160_v44 = vadd.f32 %v2159_v62, %v4941_v36 }
 0x3b4   : > { %v4949_v39 = vpop.f32.mrf.mxu0 }
 0x3b5   : > { %v2161_v40 = vadd.f32 %v2160_v44, %v4949_v39 }
 0x3b6   : > { %v4952_v41 = vpop.f32.mrf.mxu0 }
 0x3b7   : > { %v2162_v9 = vadd.f32 %v4939_v35, %v2161_v40 }
 0x3b8   : > { %v4955_v54 = vpop.f32.mrf.mxu0 }
 0x3b9   : > { %v2163_v12 = vadd.f32 %v4945_v50, %v2162_v9  ;;  %v2212_v45 = vmul.f32 %v4955_v54, %v4955_v54 }
 0x3ba   : > { %v4958_v3 = vpop.f32.mrf.mxu0 }
 0x3bb   : > { %v2164_v6 = vrot.slane %v2163_v12, 4 }
 0x3bc   : > { %v4961_v49 = vpop.f32.mrf.mxu0 }
 0x3bd   : > { %v2170_v25 = vadd.f32 %v4961_v49, %v4955_v54  ;;  %v2213_v63 = vmul.f32 %v4961_v49, %v4961_v49  ;;  %v2165_v62 = vadd.f32 %v2164_v6, %v2163_v12 }
 0x3be   : > { %v4966_v5 = vpop.f32.mrf.mxu0 }
 0x3bf   : > { %v2171_v16 = vadd.f32 %v4952_v41, %v2170_v25  ;;  %v2198_v25 = vmul.f32 %v4915_v11, %v4915_v11  ;;  %v2166_v61 = vrot.slane %v2165_v62, 2 }
 0x3c0   : > { %v4970_v24 = vpop.f32.mrf.mxu0 }
 0x3c1   : > { %v2172_v60 = vadd.f32 %v4958_v3, %v2171_v16  ;;  %v2254_v16 = vadd.f32 %v2213_v63, %v2212_v45 }
 0x3c2   : > { %v4974_v52 = vpop.f32.mrf.mxu0 }
 0x3c3   : > { %v2173_v8 = vadd.f32 %v2172_v60, %v4970_v24 }
 0x3c4   : > { %v4978_v26 = vpop.f32.mrf.mxu0 }
 0x3c5   : > { %v2174_v10 = vadd.f32 %v2173_v8, %v4978_v26 }
 0x3c6   : > { %v4982_v2 = vpop.f32.mrf.mxu0 }
 0x3c7   : > { %v2175_v14 = vadd.f32 %v4966_v5, %v2174_v10  ;;  %v2229_v10 = vadd.f32 %v2228_v47, %v2198_v25  ;;  %v2222_v27 = vmul.f32 %v4982_v2, %v4982_v2  ;;  %v2167_v47 = vadd.f32 %v2166_v61, %v2165_v62 }
 0x3c8   : > { %v4986_v20 = vpop.f32.mrf.mxu0  ;;  %v2216_v62 = vmul.f32 %v4970_v24, %v4970_v24  ;;  %v2209_v61 = vmul.f32 %v4949_v39, %v4949_v39 }
 0x3c9   : > { %v2176_v55 = vadd.f32 %v4974_v52, %v2175_v14  ;;  %v2220_v46 = vmul.f32 %v4986_v20, %v4986_v20  ;;  %v2214_v14 = vmul.f32 %v4952_v41, %v4952_v41 }
 0x3ca   : > { %v4990_v53 = vpop.f32.mrf.mxu0 }
 0x3cb   : > { %v2177_v22 = vrot.slane %v2176_v55, 4  ;;  %v2223_v37 = vmul.f32 %v4990_v53, %v4990_v53 }
 0x3cc   : > { %v4997_v59 = vpop.f32.mrf.mxu0 }
 0x3cd   : > { %v2183_v19 = vadd.f32 %v4997_v59, %v4986_v20  ;;  %v2221_v15 = vmul.f32 %v4997_v59, %v4997_v59  ;;  %v2178_v40 = vadd.f32 %v2177_v22, %v2176_v55  ;;  %v2199_v55 = vmul.f32 %v4919_v4, %v4919_v4 }
 0x3ce   : > { %v5007_v58 = vpop.f32.mrf.mxu0 }
 0x3cf   : > { %v2184_v18 = vadd.f32 %v4982_v2, %v2183_v19  ;;  %v2267_v8 = vadd.f32 %v2221_v15, %v2220_v46  ;;  %v2255_v19 = vadd.f32 %v2254_v16, %v2214_v14  ;;  %v2179_v23 = vrot.slane %v2178_v40, 2 }
 0x3d0   : > { %v5014_v42 = vpop.f32.mrf.mxu0  ;;  %v2230_v13 = vadd.f32 %v2229_v10, %v2199_v55  ;;  %v2215_v15 = vmul.f32 %v4958_v3, %v4958_v3  ;;  %v2200_v46 = vmul.f32 %v4925_v29, %v4925_v29  ;;  %v2154_v16 = vadd.f32 %v2153_v7, %v2152_v33 }
 0x3d1   : > { %v2185_v44 = vadd.f32 %v4990_v53, %v2184_v18  ;;  %v2268_v63 = vadd.f32 %v2267_v8, %v2222_v27  ;;  %v2243_v18 = vadd.f32 %v2242_v48, %v2207_v57  ;;  %v2180_v43 = vadd.f32 %v2179_v23, %v2178_v40 }
 0x3d2   : > { %v5023_v60 = vpop.f32.mrf.mxu0  ;;  %v2256_v25 = vadd.f32 %v2255_v19, %v2215_v15  ;;  %v2231_v10 = vadd.f32 %v2230_v13, %v2200_v46  ;;  %v2168_v14 = vrot.slane %v2167_v47, 1  ;;  %v2224_v27 = vmul.f32 %v5014_v42, %v5014_v42 }
 0x3d3   : > { %v2186_v9 = vadd.f32 %v2185_v44, %v5014_v42  ;;  %v2208_v44 = vmul.f32 %v4941_v36, %v4941_v36  ;;  %v2269_v8 = vadd.f32 %v2268_v63, %v2223_v37  ;;  %v2201_v55 = vmul.f32 %v4929_v38, %v4929_v38 }
 0x3d4   : > { %v5028_v12 = vpop.f32.mrf.mxu0  ;;  %v2257_v40 = vadd.f32 %v2256_v25, %v2216_v62  ;;  %v2217_v33 = vmul.f32 %v4978_v26, %v4978_v26  ;;  %v2181_v57 = vrot.slane %v2180_v43, 1  ;;  %v2155_v19 = vrot.slane %v2154_v16, 1 }
 0x3d5   : > { %v2187_v6 = vadd.f32 %v2186_v9, %v5028_v12  ;;  %v2244_v48 = vadd.f32 %v2243_v18, %v2208_v44  ;;  %v2270_v23 = vadd.f32 %v2269_v8, %v2224_v27  ;;  %v2225_v63 = vmul.f32 %v5028_v12, %v5028_v12 }
 0x3d6   : > { %v2169_v18 = vadd.f32 %v2168_v14, %v2167_v47  ;;  %v2232_v15 = vadd.f32 %v2231_v10, %v2201_v55  ;;  %v2258_v37 = vadd.f32 %v2257_v40, %v2217_v33  ;;  %v2210_v46 = vmul.f32 %v4939_v35, %v4939_v35 }
 0x3d7   : > { %v2188_v22 = vadd.f32 %v5007_v58, %v2187_v6  ;;  %v2271_v44 = vadd.f32 %v2270_v23, %v2225_v63  ;;  %v2156_v25 = vadd.f32 %v2155_v19, %v2154_v16  ;;  %v2202_v62 = vmul.f32 %v4923_v28, %v4923_v28  ;;  %v3571_v23 = vld [vmem:[#allocation13 + $0x78] sm:$0xff] }
 0x3d8   : > { %v2218_v8 = vmul.f32 %v4966_v5, %v4966_v5  ;;  %v2211_v16 = vmul.f32 %v4945_v50, %v4945_v50  ;;  %v2219_v40 = vmul.f32 %v4974_v52, %v4974_v52  ;;  %v2203_v33 = vmul.f32 %v4927_v21, %v4927_v21 }
 0x3d9   : > { %v2189_v45 = vadd.f32 %v5023_v60, %v2188_v22  ;;  %v2245_v22 = vadd.f32 %v2244_v48, %v2209_v61  ;;  %v2226_v48 = vmul.f32 %v5007_v58, %v5007_v58  ;;  %v2284_v10 = vsel %vm1206_vm1, %v2169_v18, %v2156_v25 }
 0x3da   : > { %v2233_v61 = vadd.f32 %v2232_v15, %v2202_v62  ;;  %v2227_v19 = vmul.f32 %v5023_v60, %v5023_v60  ;;  %v3573_v15 = vld [vmem:[#allocation13 + $0x68] sm:$0xff] }
 0x3db   : > { %v2190_v9 = vrot.slane %v2189_v45, 4  ;;  %v2246_v27 = vadd.f32 %v2245_v22, %v2210_v46 }
 0x3dc   : > { %v2234_v63 = vadd.f32 %v2233_v61, %v2203_v33 }
 0x3dd   : > { %v2191_v6 = vadd.f32 %v2190_v9, %v2189_v45  ;;  %v2182_v45 = vadd.f32 %v2181_v57, %v2180_v43  ;;  %v2259_v43 = vadd.f32 %v2258_v37, %v2218_v8  ;;  %v2247_v57 = vadd.f32 %v2246_v27, %v2211_v16  ;;  %v3578_v16 = vld [vmem:[#allocation13 + $0x40] sm:$0xff] }
 0x3df   : > { %v2192_v7 = vrot.slane %v2191_v6, 2  ;;  %v2285_v14 = vsel %vm1208_vm2, %v2182_v45, %v2284_v10  ;;  %v2248_v18 = vrot.slane %v2247_v57, 4  ;;  %v2235_v45 = vrot.slane %v2234_v63, 4  ;;  %v3577_v10 = vld [vmem:[#allocation13 + $0x48] sm:$0xff] }
 0x3e1   : > { %v2193_v13 = vadd.f32 %v2192_v7, %v2191_v6  ;;  %v2272_v6 = vadd.f32 %v2271_v44, %v2226_v48  ;;  %v2260_v7 = vadd.f32 %v2259_v43, %v2219_v40  ;;  %v3574_v44 = vld [vmem:[#allocation13 + $0x60] sm:$0xff]  ;;  %v2249_v25 = vadd.f32 %v2248_v18, %v2247_v57  ;;  %v3576_v48 = vld [vmem:[#allocation13 + $0x50] sm:$0xff] }
 0x3e2   : > { %v2236_v8 = vadd.f32 %v2235_v45, %v2234_v63  ;;  %v3580_v57 = vld [vmem:[#allocation13 + $0x30] sm:$0xff] }
 0x3e3   : > { %v2194_v9 = vrot.slane %v2193_v13, 1  ;;  %v2273_v22 = vadd.f32 %v2272_v6, %v2227_v19  ;;  %v2261_v37 = vrot.slane %v2260_v7, 4 }
 0x3e5   : > { %v2195_v47 = vadd.f32 %v2194_v9, %v2193_v13  ;;  %v3572_v13 = vld [vmem:[#allocation13 + $0x70] sm:$0xff]  ;;  %v2274_v46 = vrot.slane %v2273_v22, 4  ;;  %v3575_v9 = vld [vmem:[#allocation13 + $0x58] sm:$0xff]  ;;  %v2262_v62 = vadd.f32 %v2261_v37, %v2260_v7 }
 0x3e7   : > { %v2286_v55 = vsel %vm1210_vm3, %v2195_v47, %v2285_v14  ;;  %v2275_v27 = vadd.f32 %v2274_v46, %v2273_v22  ;;  %v2250_v47 = vrot.slane %v2249_v25, 2  ;;  %v2263_v43 = vrot.slane %v2262_v62, 2  ;;  %v3582_v22 = vld [vmem:[#allocation13 + $0x20] sm:$0xff]  ;;  %v3584_v46 = vld [vmem:[#allocation13 + $0x10] sm:$0xff] }
 0x3e8   : > { %3395 = vmatmul.mubr.f32.vlgmr.msra.gmra.mxu1 %v2286_v55  ;;  %v2237_v14 = vrot.slane %v2236_v8, 2  ;;  %v3579_v55 = vld [vmem:[#allocation13 + $0x38] sm:$0xff] }
 0x3e9   : > { %3398 = vmatpush3.msra.mxu1 %v3571_v23  ;;  %3429 = vmatprep.mubr.msk.f32.mxu1 %vm3867_vm4, %v5546_v56  ;;  %v2276_v61 = vrot.slane %v2275_v27, 2  ;;  %v2251_v6 = vadd.f32 %v2250_v47, %v2249_v25  ;;  %v2264_v40 = vadd.f32 %v2263_v43, %v2262_v62  ;;  %v3581_v23 = vld [vmem:[#allocation13 + $0x28] sm:$0xff] }
 0x3ea   : > { %3399 = vmatprep.subr.mxu1 %v5546_v56  ;;  %v2238_v33 = vadd.f32 %v2237_v14, %v2236_v8 }
 0x3eb   : > { %3400 = vmatpush3.msra.mxu1 %v3572_v13  ;;  %v2277_v19 = vadd.f32 %v2276_v61, %v2275_v27  ;;  %v2252_v7 = vrot.slane %v2251_v6, 1  ;;  %v2265_v63 = vrot.slane %v2264_v40, 1  ;;  %v3586_v27 = vld [vmem:[#allocation13] sm:$0xff] }
 0x3ec   : > { %3401 = vmatprep.subr.mxu1 %v5546_v56  ;;  %v2239_v13 = vrot.slane %v2238_v33, 1 }
 0x3ed   : > { %3402 = vmatpush3.msra.mxu1 %v3573_v15  ;;  %v2278_v18 = vrot.slane %v2277_v19, 1  ;;  %v3583_v15 = vld [vmem:[#allocation13 + $0x18] sm:$0xff]  ;;  %v2253_v37 = vadd.f32 %v2252_v7, %v2251_v6  ;;  %v2266_v45 = vadd.f32 %v2265_v63, %v2264_v40 }
 0x3ee   : > { %3403 = vmatprep.subr.mxu1 %v5546_v56 }
 0x3ef   : > { %3404 = vmatpush3.msra.mxu1 %v3574_v44  ;;  %v2240_v44 = vadd.f32 %v2239_v13, %v2238_v33  ;;  %v2279_v25 = vadd.f32 %v2278_v18, %v2277_v19  ;;  %v2992_v19 = vld [vmem:[%s5458_s9] ss:$0 sm:$0xff] }
 0x3f0   : > { %3405 = vmatprep.subr.mxu1 %v5546_v56 }
 0x3f1   : > { %3406 = vmatpush3.msra.mxu1 %v3575_v9  ;;  %v3585_v9 = vld [vmem:[#allocation13 + $0x8] sm:$0xff]  ;;  %v2362_v62 = vsel %vm1206_vm1, %v2253_v37, %v2240_v44 }
 0x3f2   : > { %3407 = vmatprep.subr.mxu1 %v5546_v56  ;;  %v2363_v8 = vsel %vm1208_vm2, %v2266_v45, %v2362_v62 }
 0x3f3   : > { %3408 = vmatpush3.msra.mxu1 %v3576_v48  ;;  %v2364_v48 = vsel %vm1210_vm3, %v2279_v25, %v2363_v8 }
 0x3f4   : > { %3409 = vmatprep.subr.mxu1 %v5546_v56 }
 0x3f5   : > { %3410 = vmatpush3.msra.mxu1 %v3577_v10 }
 0x3f6   : > { %3411 = vmatprep.subr.mxu1 %v5546_v56 }
 0x3f7   : > { %3412 = vmatpush3.msra.mxu1 %v3578_v16 }
 0x3f8   : > { %3413 = vmatprep.subr.mxu1 %v5546_v56 }
 0x3f9   : > { %3414 = vmatpush3.msra.mxu1 %v3579_v55 }
 0x3fa   : > { %3415 = vmatprep.subr.mxu1 %v5546_v56 }
 0x3fb   : > { %3416 = vmatpush3.msra.mxu1 %v3580_v57 }
 0x3fc   : > { %3417 = vmatprep.subr.mxu1 %v5546_v56 }
 0x3fd   : > { %3418 = vmatpush3.msra.mxu1 %v3581_v23 }
 0x3fe   : > { %3419 = vmatprep.subr.mxu1 %v5546_v56 }
 0x3ff   : > { %3420 = vmatpush3.msra.mxu1 %v3582_v22 }
 0x400   : > { %3421 = vmatprep.subr.mxu1 %v5546_v56 }
 0x401   : > { %3422 = vmatpush3.msra.mxu1 %v3583_v15 }
 0x402   : > { %3423 = vmatprep.subr.mxu1 %v5546_v56 }
 0x403   : > { %3424 = vmatpush3.msra.mxu1 %v3584_v46 }
 0x404   : > { %3425 = vmatprep.subr.mxu1 %v5546_v56 }
 0x405   : > { %3426 = vmatpush3.msra.mxu1 %v3585_v9 }
 0x406   : > { %3427 = vmatprep.subr.mxu1 %v5546_v56  ;;  %v2991_v56 = vld [vmem:[%s5457_s8] ss:$0 sm:$0xff] }
 0x407   : > { %3428 = vmatpush3.msra.mxu1 %v3586_v27 }
 0x408   : > { %3430 = vmatmul.mubr.f32.vlgmr.msra.gmra.mxu1 %v2364_v48 }
 0x4a8   : > { %v2354_v47 = vpop.f32.mrf.mxu1 }
 0x4a9   : > { %v2436_v43 = vmul.f32 %v2354_v47, %v2354_v47 }
 0x4aa   : > { %v3396_v10 = vpop.f32.mrf.mxu1 }
 0x4c8   : > { %v2432_v14 = vpop.f32.mrf.mxu1 }
 0x4c9   : > { %v2437_v61 = vsub.f32 %v2432_v14, %v2436_v43 }
 0x4ca   : > { %v3431_v16 = vpop.f32.mrf.mxu1 }
 0x4cb   : > { %v2438_v6 = vmax.f32 %v2437_v61, 0.0 }
 0x4cd   : > { %v2439_v55 = vadd.f32 1e-05, %v2438_v6 }
 0x4cf   : > { %3569 = vrsqrt.f32 %v2439_v55 }
 0x4dc   : > { %v3570_v40 = vpop.eup %3569 }
 0x4dd   : > { %v2447_v33 = vmul.f32 %v3570_v40, %v2991_v56 }
 0x4df   : > { %v2448_v57 = vmul.f32 %v2447_v33, %v2354_v47  ;;  %v2463_v7 = vrot.slane %v2447_v33, %v4778_v17 }
 0x4e1   : > { %v2455_v23 = vsub.f32 %v2992_v19, %v2448_v57  ;;  %v2464_v63 = vcombine.high %v2463_v7, %v2463_v7  ;;  %v2471_v13 = vrot.slane %v2463_v7, %v4778_v17 }
 0x4e3   : > { %v2540_v22 = vrot.slane %v2455_v23, %v4778_v17  ;;  %v2478_v18 = vrot.slane %v2464_v63, %v4778_v17  ;;  %v2479_v37 = vcombine.high %v2471_v13, %v2471_v13  ;;  %v2484_v45 = vrot.slane %v2471_v13, %v4784_v51 }
 0x4e5   : > { %v2541_v15 = vcombine.high %v2540_v22, %v2540_v22  ;;  %v2548_v46 = vrot.slane %v2540_v22, %v4778_v17  ;;  %v2480_v44 = vcombine.high %v2478_v18, %v2478_v18  ;;  %v2488_v9 = vrot.slane %v2478_v18, %v4784_v51 }
 0x4e6   : > { %v2492_v62 = vrot.slane %v2479_v37, %v4784_v51  ;;  %v2501_v8 = vmul.f32 %v2484_v45, %v4917_v1  ;;  %v2502_v27 = vmul.f32 %v2484_v45, %v4921_v0  ;;  %v2503_v43 = vmul.f32 %v4915_v11, %v2484_v45 }
 0x4e7   : > { %v2555_v25 = vrot.slane %v2541_v15, %v4778_v17  ;;  %v2556_v48 = vcombine.high %v2548_v46, %v2548_v46  ;;  %v2496_v47 = vrot.slane %v2480_v44, %v4784_v51  ;;  %v2504_v14 = vmul.f32 %v4919_v4, %v2484_v45 }
 0x4e8   : > { %v2561_v61 = vrot.slane %v2548_v46, %v4784_v51  ;;  %v2505_v17 = vmul.f32 %v2484_v45, %v4925_v29  ;;  %v2506_v16 = vmul.f32 %v2484_v45, %v4929_v38  ;;  %v2507_v6 = vmul.f32 %v4923_v28, %v2484_v45 }
 0x4e9   : > { %v2557_v10 = vcombine.high %v2555_v25, %v2555_v25  ;;  %v2508_v1 = vmul.f32 %v4927_v21, %v2484_v45  ;;  %v2509_v0 = vmul.f32 %v2488_v9, %v4933_v31  ;;  %v2510_v55 = vmul.f32 %v2488_v9, %v4937_v34 }
 0x4ea   : > { %v2511_v56 = vmul.f32 %v4931_v30, %v2488_v9  ;;  %v2565_v11 = vrot.slane %v2555_v25, %v4784_v51  ;;  %v2569_v4 = vrot.slane %v2556_v48, %v4784_v51  ;;  %v2512_v40 = vmul.f32 %v4935_v32, %v2488_v9 }
 0x4eb   : > { %v2513_v29 = vmul.f32 %v2488_v9, %v4941_v36  ;;  %v5131_v38 = vrot.slane %v2557_v10, %v4784_v51  ;;  %v2514_v28 = vmul.f32 %v2488_v9, %v4949_v39  ;;  %v2515_v21 = vmul.f32 %v4939_v35, %v2488_v9 }
 0x4ec   : > { %v2516_v31 = vmul.f32 %v4945_v50, %v2488_v9  ;;  %v2517_v34 = vmul.f32 %v2492_v62, %v4955_v54  ;;  %v2518_v30 = vmul.f32 %v2492_v62, %v4961_v49  ;;  %v2519_v33 = vmul.f32 %v4952_v41, %v2492_v62 }
 0x4ed   : > { %v2520_v57 = vmul.f32 %v4958_v3, %v2492_v62  ;;  %v2521_v32 = vmul.f32 %v2492_v62, %v4970_v24  ;;  %v2522_v36 = vmul.f32 %v2492_v62, %v4978_v26  ;;  %v2523_v51 = vmul.f32 %v4966_v5, %v2492_v62 }
 0x4ee   : > { %v2524_v39 = vmul.f32 %v4974_v52, %v2492_v62  ;;  %v2525_v35 = vmul.f32 %v2496_v47, %v4986_v20  ;;  %v2526_v50 = vmul.f32 %v2496_v47, %v4997_v59  ;;  %v2527_v54 = vmul.f32 %v4982_v2, %v2496_v47 }
 0x4ef   : > { %v2528_v49 = vmul.f32 %v4990_v53, %v2496_v47  ;;  %v2529_v41 = vmul.f32 %v2496_v47, %v5014_v42  ;;  %v2530_v3 = vmul.f32 %v2496_v47, %v5028_v12  ;;  %v2531_v24 = vmul.f32 %v5007_v58, %v2496_v47 }
 0x4f0   : > { %v2532_v26 = vmul.f32 %v5023_v60, %v2496_v47  ;;  %v5152_v19 = vadd.f32 %v2561_v61, %v2501_v8  ;;  %v5154_v5 = vadd.f32 %v2561_v61, %v2502_v27  ;;  %v5156_v52 = vadd.f32 %v2561_v61, %v2503_v43 }
 0x4f1   : > { %v5158_v20 = vadd.f32 %v2561_v61, %v2504_v14  ;;  %v5160_v59 = vadd.f32 %v2561_v61, %v2505_v17  ;;  %v5162_v2 = vadd.f32 %v2561_v61, %v2506_v16  ;;  %v5164_v53 = vadd.f32 %v2561_v61, %v2507_v6 }
 0x4f2   : > { %v5166_v42 = vadd.f32 %v2561_v61, %v2508_v1  ;;  %v5168_v12 = vadd.f32 %v2565_v11, %v2509_v0  ;;  %v5170_v58 = vadd.f32 %v2565_v11, %v2510_v55  ;;  %v5172_v60 = vadd.f32 %v2565_v11, %v2511_v56 }
 0x4f3   : > { %v5174_v23 = vadd.f32 %v2565_v11, %v2512_v40  ;;  %v5176_v7 = vadd.f32 %v2565_v11, %v2513_v29  ;;  %v5178_v63 = vadd.f32 %v2565_v11, %v2514_v28  ;;  %v5180_v22 = vadd.f32 %v2565_v11, %v2515_v21 }
 0x4f4   : > { %v5182_v13 = vadd.f32 %v2565_v11, %v2516_v31  ;;  %v5184_v18 = vadd.f32 %v2569_v4, %v2517_v34  ;;  %v5186_v15 = vadd.f32 %v2569_v4, %v2518_v30  ;;  %v5188_v37 = vadd.f32 %v2569_v4, %v2519_v33 }
 0x4f5   : > { %v5190_v45 = vadd.f32 %v2569_v4, %v2520_v57  ;;  %v5192_v46 = vadd.f32 %v2569_v4, %v2521_v32  ;;  %v5194_v44 = vadd.f32 %v2569_v4, %v2522_v36  ;;  %v5196_v25 = vadd.f32 %v2569_v4, %v2523_v51 }
 0x4f6   : > { %v5198_v9 = vadd.f32 %v2569_v4, %v2524_v39  ;;  %v5201_v62 = vadd.f32 %v5131_v38, %v2525_v35  ;;  %v5204_v8 = vadd.f32 %v5131_v38, %v2526_v50  ;;  %v5207_v27 = vadd.f32 %v5131_v38, %v2527_v54 }
 0x4f7   : > { %v5210_v48 = vadd.f32 %v5131_v38, %v2528_v49  ;;  %v5213_v47 = vadd.f32 %v5131_v38, %v2529_v41  ;;  %v5216_v10 = vadd.f32 %v5131_v38, %v2530_v3  ;;  %vm2610_vm1 = vcmp.ge.f32.partialorder %v5152_v19, 0.0 }
 0x4f8   : > { %vm2611_vm2 = vcmp.ge.f32.partialorder %v5154_v5, 0.0  ;;  %vm2612_vm3 = vcmp.ge.f32.partialorder %v5156_v52, 0.0  ;;  %vm2613_vm4 = vcmp.ge.f32.partialorder %v5158_v20, 0.0  ;;  %vm2614_vm13 = vcmp.ge.f32.partialorder %v5160_v59, 0.0 }
 0x4f9   : > { %vm2618_vm14 = vcmp.ge.f32.partialorder %v5168_v12, 0.0  ;;  %vm2615_vm15 = vcmp.ge.f32.partialorder %v5162_v2, 0.0  ;;  %vm2619_vm0 = vcmp.ge.f32.partialorder %v5170_v58, 0.0  ;;  %vm2626_vm5 = vcmp.ge.f32.partialorder %v5184_v18, 0.0 }
 0x4fa   : > { %vm2627_vm6 = vcmp.ge.f32.partialorder %v5186_v15, 0.0  ;;  %v2642_v43 = vmul.f32 0.1, %v5152_v19  ;;  %vm2634_vm7 = vcmp.ge.f32.partialorder %v5201_v62, 0.0  ;;  %vm2635_vm8 = vcmp.ge.f32.partialorder %v5204_v8, 0.0 }
 0x4fb   : > { %v2643_v14 = vmul.f32 0.1, %v5154_v5  ;;  %v2644_v61 = vmul.f32 0.1, %v5156_v52  ;;  %v5234_v17 = vadd.f32 %v5131_v38, %v2531_v24  ;;  %vm2620_vm9 = vcmp.ge.f32.partialorder %v5172_v60, 0.0 }
 0x4fc   : > { %v2645_v16 = vmul.f32 0.1, %v5158_v20  ;;  %v2646_v6 = vmul.f32 0.1, %v5160_v59  ;;  %v2647_v1 = vmul.f32 0.1, %v5162_v2  ;;  %v5243_v0 = vadd.f32 %v5131_v38, %v2532_v26 }
 0x4fd   : > { %v5246_v55 = vmul.f32 0.1, %v5164_v53  ;;  %v5249_v56 = vmul.f32 0.1, %v5166_v42  ;;  %v2650_v11 = vmul.f32 0.1, %v5168_v12  ;;  %v2674_v38 = vsel %vm2610_vm1, %v5152_v19, %v2642_v43 }
 0x4fe   : > { %v2651_v4 = vmul.f32 0.1, %v5170_v58  ;;  %v2652_v40 = vmul.f32 0.1, %v5172_v60  ;;  %v2653_v29 = vmul.f32 0.1, %v5174_v23  ;;  %v2675_v34 = vsel %vm2611_vm2, %v5154_v5, %v2643_v14 }
 0x4ff   : > { %v2658_v28 = vmul.f32 0.1, %v5184_v18  ;;  %v2659_v21 = vmul.f32 0.1, %v5186_v15  ;;  %v2666_v31 = vmul.f32 0.1, %v5201_v62  ;;  %v2676_v32 = vsel %vm2612_vm3, %v5156_v52, %v2644_v61 }
 0x500   : > { %vm2622_vm10 = vcmp.ge.f32.partialorder %v5176_v7, 0.0  ;;  %vm2630_vm11 = vcmp.ge.f32.partialorder %v5192_v46, 0.0  ;;  %v2654_v30 = vmul.f32 0.1, %v5176_v7  ;;  %v5272_v33 = vmul.f32 0.1, %v5178_v63 }
 0x501   : > { %v2667_v57 = vmul.f32 0.1, %v5204_v8  ;;  %v5279_v36 = vmul.f32 0.1, %v5180_v22  ;;  %v5282_v51 = vmul.f32 0.1, %v5182_v13  ;;  %v2677_v35 = vsel %vm2613_vm4, %v5158_v20, %v2645_v16 }
 0x502   : > { %v2660_v39 = vmul.f32 0.1, %v5188_v37  ;;  %vm2623_vm1 = vcmp.ge.f32.partialorder %v5178_v63, 0.0  ;;  %vm2631_vm2 = vcmp.ge.f32.partialorder %v5194_v44, 0.0  ;;  %vm2639_vm12 = vcmp.ge.f32.partialorder %v5216_v10, 0.0 }
 0x503   : > { %v2661_v50 = vmul.f32 0.1, %v5190_v45  ;;  %v2668_v54 = vmul.f32 0.1, %v5207_v27  ;;  %v2678_v49 = vsel %vm2614_vm13, %v5160_v59, %v2646_v6  ;;  %v2682_v41 = vsel %vm2618_vm14, %v5168_v12, %v2650_v11 }
 0x504   : > { %vm2616_vm3 = vcmp.ge.f32.partialorder %v5164_v53, 0.0  ;;  %v2683_v3 = vsel %vm2619_vm0, %v5170_v58, %v2651_v4  ;;  %v2690_v24 = vsel %vm2626_vm5, %v5184_v18, %v2658_v28  ;;  %v2691_v26 = vsel %vm2627_vm6, %v5186_v15, %v2659_v21 }
 0x505   : > { %v2698_v19 = vsel %vm2634_vm7, %v5201_v62, %v2666_v31  ;;  %vm2624_vm4 = vcmp.ge.f32.partialorder %v5180_v22, 0.0  ;;  %vm2632_vm13 = vcmp.ge.f32.partialorder %v5196_v25, 0.0  ;;  %vm2640_vm14 = vcmp.ge.f32.partialorder %v5234_v17, 0.0 }
 0x506   : > { %v2662_v5 = vmul.f32 0.1, %v5192_v46  ;;  %v2663_v52 = vmul.f32 0.1, %v5194_v44  ;;  %v2664_v20 = vmul.f32 0.1, %v5196_v25  ;;  %v2699_v59 = vsel %vm2635_vm8, %v5204_v8, %v2667_v57 }
 0x507   : > { %vm2617_vm0 = vcmp.ge.f32.partialorder %v5166_v42, 0.0  ;;  %v2665_v12 = vmul.f32 0.1, %v5198_v9  ;;  %v2669_v58 = vmul.f32 0.1, %v5210_v48  ;;  %v2679_v18 = vsel %vm2615_vm15, %v5162_v2, %v2647_v1 }
 0x508   : > { %v2706_v15 = vmax.f32 %v2674_v38, %v2675_v34  ;;  %vm2625_vm5 = vcmp.ge.f32.partialorder %v5182_v13, 0.0  ;;  %vm2633_vm6 = vcmp.ge.f32.partialorder %v5198_v9, 0.0  ;;  %v2670_v62 = vmul.f32 0.1, %v5213_v47 }
 0x509   : > { %v2719_v8 = vmax.f32 %v2682_v41, %v2683_v3  ;;  %v2732_v43 = vmax.f32 %v2690_v24, %v2691_v26  ;;  %v2745_v14 = vmax.f32 %v2698_v19, %v2699_v59  ;;  %v2684_v61 = vsel %vm2620_vm9, %v5172_v60, %v2652_v40 }
 0x50a   : > { %vm5567_vm8 = vcmp.ge.f32.partialorder %v5188_v37, 0.0  ;;  %vm5568_vm15 = vcmp.ge.f32.partialorder %v5207_v27, 0.0  ;;  %v2707_v6 = vmax.f32 %v2706_v15, %v2676_v32  ;;  %v2671_v1 = vmul.f32 0.1, %v5216_v10 }
 0x50b   : > { %v2692_v2 = vsel %vm5567_vm8, %v5188_v37, %v2660_v39  ;;  %v2700_v16 = vsel %vm5568_vm15, %v5207_v27, %v2668_v54  ;;  %v2720_v11 = vmax.f32 %v2719_v8, %v2684_v61  ;;  %vm5569_vm7 = vcmp.ge.f32.partialorder %v5174_v23, 0.0 }
 0x50c   : > { %v2733_v4 = vmax.f32 %v2732_v43, %v2692_v2  ;;  %v2746_v38 = vmax.f32 %v2745_v14, %v2700_v16  ;;  %v2685_v28 = vsel %vm5569_vm7, %v5174_v23, %v2653_v29  ;;  %vm5570_vm9 = vcmp.ge.f32.partialorder %v5190_v45, 0.0 }
 0x50d   : > { %v2693_v60 = vsel %vm5570_vm9, %v5190_v45, %v2661_v50  ;;  %vm5571_vm8 = vcmp.ge.f32.partialorder %v5210_v48, 0.0  ;;  %v2708_v40 = vmax.f32 %v2707_v6, %v2677_v35  ;;  %v2672_v27 = vmul.f32 0.1, %v5234_v17 }
 0x50e   : > { %v2701_v37 = vsel %vm5571_vm8, %v5210_v48, %v2669_v58  ;;  %v2721_v21 = vmax.f32 %v2720_v11, %v2685_v28  ;;  %v2734_v31 = vmax.f32 %v2733_v4, %v2693_v60  ;;  %v2686_v57 = vsel %vm2622_vm10, %v5176_v7, %v2654_v30 }
 0x50f   : > { %v2747_v34 = vmax.f32 %v2746_v38, %v2701_v37  ;;  %v2694_v23 = vsel %vm2630_vm11, %v5192_v46, %v2662_v5  ;;  %vm5572_vm7 = vcmp.ge.f32.partialorder %v5213_v47, 0.0  ;;  %v2709_v29 = vmax.f32 %v2708_v40, %v2678_v49 }
 0x510   : > { %v2702_v45 = vsel %vm5572_vm7, %v5213_v47, %v2670_v62  ;;  %v2673_v48 = vmul.f32 0.1, %v5243_v0  ;;  %v2722_v32 = vmax.f32 %v2721_v21, %v2686_v57  ;;  %v2735_v39 = vmax.f32 %v2734_v31, %v2694_v23 }
 0x511   : > { %v2748_v35 = vmax.f32 %v2747_v34, %v2702_v45  ;;  %v2687_v50 = vsel %vm2623_vm1, %v5178_v63, %v5272_v33  ;;  %v2695_v7 = vsel %vm2631_vm2, %v5194_v44, %v2663_v52  ;;  %v2703_v46 = vsel %vm2639_vm12, %v5216_v10, %v2671_v1 }
 0x512   : > { %v2710_v47 = vmax.f32 %v2709_v29, %v2679_v18  ;;  %v2680_v30 = vsel %vm2616_vm3, %v5164_v53, %v5246_v55  ;;  %v2723_v54 = vmax.f32 %v2722_v32, %v2687_v50  ;;  %v2736_v49 = vmax.f32 %v2735_v39, %v2695_v7 }
 0x513   : > { %v2749_v41 = vmax.f32 %v2748_v35, %v2703_v46  ;;  %v2688_v63 = vsel %vm2624_vm4, %v5180_v22, %v5279_v36  ;;  %v2696_v44 = vsel %vm2632_vm13, %v5196_v25, %v2664_v20  ;;  %v2704_v10 = vsel %vm2640_vm14, %v5234_v17, %v2672_v27 }
 0x514   : > { %v2711_v33 = vmax.f32 %v2710_v47, %v2680_v30  ;;  %v2681_v53 = vsel %vm2617_vm0, %v5166_v42, %v5249_v56  ;;  %v2724_v55 = vmax.f32 %v2723_v54, %v2688_v63  ;;  %v2737_v3 = vmax.f32 %v2736_v49, %v2696_v44 }
 0x515   : > { %v2750_v24 = vmax.f32 %v2749_v41, %v2704_v10  ;;  %v2689_v22 = vsel %vm2625_vm5, %v5182_v13, %v5282_v51  ;;  %v2697_v25 = vsel %vm2633_vm6, %v5198_v9, %v2665_v12  ;;  %vm5573_vm10 = vcmp.ge.f32.partialorder %v5243_v0, 0.0 }
 0x516   : > { %v2705_v17 = vsel %vm5573_vm10, %v5243_v0, %v2673_v48  ;;  %v2712_v36 = vmax.f32 %v2711_v33, %v2681_v53  ;;  %v2725_v26 = vmax.f32 %v2724_v55, %v2689_v22  ;;  %v2738_v42 = vmax.f32 %v2737_v3, %v2697_v25 }
 0x517   : > { %v2751_v56 = vmax.f32 %v2750_v24, %v2705_v17 }
 0x518   : > { %v2713_v19 = vrot.slane %v2712_v36, 4  ;;  %v2726_v5 = vrot.slane %v2725_v26, 4  ;;  %v2739_v52 = vrot.slane %v2738_v42, 4 }
 0x519   : > { %v2752_v20 = vrot.slane %v2751_v56, 4 }
 0x51a   : > { %v2714_v59 = vmax.f32 %v2712_v36, %v2713_v19  ;;  %v2727_v58 = vmax.f32 %v2725_v26, %v2726_v5  ;;  %v2740_v13 = vmax.f32 %v2738_v42, %v2739_v52 }
 0x51b   : > { %v2753_v51 = vmax.f32 %v2751_v56, %v2752_v20 }
 0x51c   : > { %v2715_v18 = vrot.slane %v2714_v59, 2  ;;  %v2728_v9 = vrot.slane %v2727_v58, 2  ;;  %v2741_v12 = vrot.slane %v2740_v13, 2 }
 0x51d   : > { %v2754_v15 = vrot.slane %v2753_v51, 2 }
 0x51e   : > { %v2716_v62 = vmax.f32 %v2714_v59, %v2715_v18  ;;  %v2729_v0 = vmax.f32 %v2727_v58, %v2728_v9  ;;  %v2742_v8 = vmax.f32 %v2740_v13, %v2741_v12 }
 0x51f   : > { %v2755_v43 = vmax.f32 %v2753_v51, %v2754_v15 }
 0x520   : > { %v2717_v14 = vrot.slane %v2716_v62, 1  ;;  %v2730_v61 = vrot.slane %v2729_v0, 1  ;;  %v2743_v2 = vrot.slane %v2742_v8, 1 }
 0x521   : > { %v2756_v16 = vrot.slane %v2755_v43, 1 }
 0x522   : > { %v2718_v6 = vmax.f32 %v2716_v62, %v2717_v14  ;;  %v2731_v1 = vmax.f32 %v2729_v0, %v2730_v61  ;;  %v2744_v11 = vmax.f32 %v2742_v8, %v2743_v2 }
 0x523   : > { %v2757_v4 = vmax.f32 %v2755_v43, %v2756_v16 }
 0x524   : > { %v2758_v38 = vmax.f32 %v2718_v6, 0.0  ;;  %v2759_v28 = vmax.f32 %v2731_v1, 0.0  ;;  %v2760_v60 = vmax.f32 %v2744_v11, 0.0 }
 0x525   : > { %v2761_v37 = vmax.f32 %v2757_v4, 0.0 }
 0x526   : > { %2762 = vst [vmem:[%s518_s13] sm:$0x1] %v2758_v38  ;;  %2763 = vst [vmem:[%s518_s13 + $0x1] sm:$0x1] %v2759_v28 }
 0x527   : > { %2764 = vst [vmem:[%s518_s13 + $0x2] sm:$0x1] %v2760_v60  ;;  %2765 = vst [vmem:[%s518_s13 + $0x3] sm:$0x1] %v2761_v37 }
 0x528   : > { %3786 = shalt.err (!%p3783_p8)
}
 0x529   : > { %s3787_s29 = scalar_lea.hbm %s5404_s27, 64  ;;  %s3791_s14 = scalar_lea.hbm %s5460_s11, 128 }
 0x52a   : > { %p3788_p3 = scmp.ne.s32.totalorder %s5404_s27, %s3787_s29  ;;  %p3792_p2 = scmp.lt.s32.totalorder %s5404_s27, %s5460_s11 }
 0x52b   : > { %p3793_p10 = scmp.lt.s32.totalorder %s3791_s14, %s3787_s29 }
 0x52c   : > { %p3789_p7 = pnand %p3788_p3, %p5574_p5 }
 0x52d   : > { %p3794_p0 = por %p3793_p10, %p3792_p2 }
 0x52e   : > { %p3790_p12 = pneg %p3789_p7 }
 0x530   : > { %p3795_p13 = pnand %p3794_p0, %p3790_p12 }
 0x532   : > { %3798 = shalt.err (!%p3795_p13)
}
 0x533   : > { %s3870_s4 = smov 16   ;;  %s3871_s10 = smov 1  }
 0x534   : > { %3456 = dma.vmem_to_hbm [thread:$0]  (%p5574_p5), %s5406_s26, 64, %s5404_s27, %s2767_s23, %s3870_s4, %s3870_s4, %s3871_s10  }
 0x535 PF: > { %s5575_s22 = sld [smem:[#allocation24_spill]]  ;;  %s2795_s15 = sand.u32 1, %s3841_s17  }
 0x536   : > { %p5577_p11 = scmp.ge.s32.totalorder %s3853_s20, 2  ;;  %s2796_s13 = scalar_lea.sflag [#allocation4], %s2795_s15 }
 0x53b   : > { %p5576_p9 = scmp.ne.s32.totalorder %s5575_s22, 0 }
 0x53d   : > { %p3482_p1 = pnand %p5577_p11, %p5576_p9 }
 0x53f   : > { %p3483_p4 = pneg %p3482_p1 }
 0x541   : > { %3836 = dma.done.wait (%p3483_p4), %s2796_s13, 64  }
 0x542   : > { %3838 = vsyncadd (%p3483_p4), %s2796_s13, 4294967232  ;;  %s5578_s20 = sld [smem:[#allocation22_spill]]  ;;  %s5581_s17 = smov %s3845_s18 }
 0x543   : > { %s5579_s21 = sld [smem:[#allocation21_spill]] }
 0x544   : > { %s5580_s19 = sld [smem:[#allocation23_spill]] }
 0x548   : > { %p29_p6 = scmp.ge.s32.totalorder %s5578_s20, 4  }
 0x549   : > { %s5582_s18 = smov %s5579_s21 }
 0x54a   :  { %31 = sbr.rel (!%p29_p6) target bundleno = 16 (0x10), region = 142 }
 0x54f   :  { %2801 = vsyncpa [#allocation3], 1 }
 0x550   :  { %2803 = vsyncpa [#allocation3 + $0x1], 1 }
 0x551   :  { %2804 = vsyncpa [#allocation6], 1 }
 0x552   :  { %2806 = vsyncpa [#allocation6 + $0x1], 1 }
 0x553   :  { %2807 = vsyncpa [#allocation9], 1 }
 0x554   :  { %2808 = vsyncpa [#allocation12], 1 }
 0x555   :  { %2809 = vsyncpa [#allocation4], 1 }
 0x556   :  { %2811 = vsyncpa [#allocation4 + $0x1], 1 }

</bundles_post_ra>
